<compile_context>
chip_gen: v7x
topology: tpu7x:2x2x1
jax: 0.10.0
libtpu: 0.0.40
codegen_flags: <defaults>
</compile_context>

<pallas_src>
import jax
import jax.numpy as jnp
import numpy as np
from jax.experimental import pallas as pl
from jax.experimental.pallas import tpu as pltpu


# --------------------------------------------------------------------------------------
# Kernel
# --------------------------------------------------------------------------------------
def repconv_kernel(xup_ref, x_ref, xdn_ref, w1_ref, wd_ref, w2_ref, b2_ref,
                   o_ref, y_ref):
    TH, W, Cin = x_ref.shape[1], x_ref.shape[2], x_ref.shape[3]
    Cout = o_ref.shape[3]
    THW = TH * W
    R = (TH + 2) * W               # tile rows + 1-row halo above/below, flattened with W
    mm_dtype = w1_ref.dtype        # bf16 on v6e/v7x for MXU peak, f32 otherwise
    tap_dtype = wd_ref.dtype       # f32 everywhere; bf16 VPU tap-multiplies on v6e/v7x
    i = pl.program_id(1)
    last = pl.num_programs(1) - 1

    # conv1x1 (BN1 scale pre-folded into w1).  Results are written straight into the
    # f32 scratch holding the zero-row-extended intermediate -- no x_ext concat copy.
    x2 = x_ref[0].reshape(THW, Cin).astype(mm_dtype)
    y_ref[pl.ds(W, THW), :] = jnp.dot(x2, w1_ref[...],
                                      preferred_element_type=jnp.float32)

    # Halo rows: the image row just above / below this tile.  At the image border they
    # are zero (a zero input row gives a zero intermediate row, which is exactly the
    # folded BNAndPad behaviour -- the constant border is carried by the output bias).
    top = jnp.where(i > 0, xup_ref[0, 0], 0).astype(mm_dtype)       # (W, Cin)
    bot = jnp.where(i < last, xdn_ref[0, 0], 0).astype(mm_dtype)    # (W, Cin)
    y_ref[pl.ds(0, W), :] = jnp.dot(top, w1_ref[...],
                                    preferred_element_type=jnp.float32)
    y_ref[pl.ds(W + THW, W), :] = jnp.dot(bot, w1_ref[...],
                                          preferred_element_type=jnp.float32)

    # Depthwise 3x3 over the zero-extended intermediate.
    # W-direction taps via XLU roll + {0,1} border columns (no misaligned sublane slices).
    y = y_ref[...]                                                   # (R, Cin) f32
    col = jax.lax.broadcasted_iota(jnp.int32, (R, 1), 0) % W
    not_first = (col != 0).astype(jnp.float32)                       # (R, 1)
    not_last = (col != W - 1).astype(jnp.float32)                    # (R, 1)
    y_l = (pltpu.roll(y, 1, axis=0) * not_first).astype(tap_dtype)   # tap at (w-1)
    y_c = y.astype(tap_dtype)                                        # tap at (w)
    y_r = (pltpu.roll(y, R - 1, axis=0) * not_last).astype(tap_dtype)  # tap at (w+1)
    taps = (y_l, y_c, y_r)

    wd = wd_ref[...]                                                 # (9, Cin) tap_dtype
    acc = jnp.zeros((THW, Cin), jnp.float32)
    for dh in range(3):                 # H-direction taps: aligned leading-dim slices
        lo = dh * W
        for dw in range(3):
            k = dh * 3 + dw
            # tap_dtype multiply (bf16 halves the VALU cost on v6e/v7x), f32 accumulate.
            acc = acc + taps[dw][lo:lo + THW, :] * wd[k:k + 1, :]

    # pointwise 1x1 (BN2 scale folded into w2) + folded bias (BN2 shift + the
    # BNAndPad constant-border term pushed through the depthwise tap-sum).
    z = jnp.dot(acc.astype(mm_dtype), w2_ref[...], preferred_element_type=jnp.float32)
    z = z + b2_ref[...]
    o_ref[0] = z.reshape(TH, W, Cout).astype(o_ref.dtype)


# --------------------------------------------------------------------------------------
# Generation-aware sizing
# --------------------------------------------------------------------------------------
def _vmem_capacity_bytes():
    """Physical VMEM per TensorCore; conservative (v7x-sized) fallback if query fails."""
    try:
        info = pltpu.get_tpu_info()
        cap = getattr(info, "vmem_capacity_bytes", None)
        if cap:
            return int(cap)
    except Exception:
        pass
    return 64 << 20


def _pick_tile_h(H, W, cin, cout, x_bytes, tap_bytes, mm_bytes, out_bytes,
                 n_batch, budget_bytes):
    # Per-output-row live VMEM: double-buffered x tile, f32 scratch, three tap_dtype
    # tap copies, f32 acc, mm-dtype cast, f32 z, double-buffered output tile.
    per_row = W * (cin * (2 * x_bytes + 4 + 3 * tap_bytes + 4 + mm_bytes)
                   + cout * (4 + 2 * out_bytes))
    th = int(max(1, min(H, budget_bytes // max(per_row, 1))))
    g = -(-H // th)
    # Megacore (v7x has 2 TensorCores): at least 2 independent grid steps...
    if n_batch * g < 2 and H > 1:
        th = -(-H // 2)
        g = -(-H // th)
    # ... and prefer an even total step count so both cores get equal work.
    if (n_batch * g) % 2 == 1 and g < H:
        th = -(-H // (g + 1))
    return th


# --------------------------------------------------------------------------------------
# Wrappers
# --------------------------------------------------------------------------------------
def repconv_pallas_nhwc(x_nhwc, folded_params, tile_h=None,
                        tap_dtype=jnp.float32, vmem_limit_bytes=None):
    """Fused RepConv forward on an NHWC input (preferred entry point end-to-end)."""
    w1k, wd9, w2k, b2p = folded_params
    N, H, W, Cin = x_nhwc.shape
    Cout = w2k.shape[1]
    tap_dtype = jnp.dtype(tap_dtype)
    out_dtype = x_nhwc.dtype

    xb = jnp.dtype(x_nhwc.dtype).itemsize
    mmb = jnp.dtype(w1k.dtype).itemsize
    tb = tap_dtype.itemsize
    ob = xb

    # Sublane alignment for the flattened (rows*W) stores / slices in the kernel.
    w_align = 16 if min(xb, tb) < 4 else 8
    W_pad = -(-W // w_align) * w_align

    cap = _vmem_capacity_bytes()
    if vmem_limit_bytes is None:
        # v5e/v6e (128 MiB physical) -> 96 MiB scoped; v7x (64 MiB) -> 48 MiB.
        vmem_limit_bytes = min(96 << 20, (cap * 3) // 4)
    budget = cap // 6   # per-step live-data target (~21 MiB v5e/v6e, ~10.7 MiB v7x)

    if tile_h is None:
        tile_h = _pick_tile_h(H, W_pad, Cin, Cout, xb, tb, mmb, ob, N, budget)
    tile_h = int(max(1, min(int(tile_h), H)))
    G = -(-H // tile_h)
    H_pad = G * tile_h

    # Ragged tail / W alignment handled by zero padding: zero input rows/cols give a
    # zero intermediate (== the folded BNAndPad border), so padding is transparent;
    # the extra output rows/cols are sliced off below.
    x_p = x_nhwc
    if H_pad != H or W_pad != W:
        x_p = jnp.pad(x_nhwc, ((0, 0), (0, H_pad - H), (0, W_pad - W), (0, 0)))

    wd9 = wd9.astype(tap_dtype)

    def up_map(n, i):     # row just above the tile (clamped; zero-masked in kernel at i==0)
        return (n, jnp.maximum(i * tile_h - 1, 0), 0, 0)

    def dn_map(n, i):     # row just below the tile (clamped; zero-masked at i==G-1)
        return (n, jnp.minimum(i * tile_h + tile_h, H_pad - 1), 0, 0)

    out = pl.pallas_call(
        repconv_kernel,
        out_shape=jax.ShapeDtypeStruct((N, H_pad, W_pad, Cout), out_dtype),
        grid_spec=pltpu.PrefetchScalarGridSpec(
            num_scalar_prefetch=0,
            grid=(N, G),
            in_specs=[
                pl.BlockSpec((1, 1, W_pad, Cin), up_map),                      # halo above
                pl.BlockSpec((1, tile_h, W_pad, Cin), lambda n, i: (n, i, 0, 0)),  # row tile
                pl.BlockSpec((1, 1, W_pad, Cin), dn_map),                      # halo below
                # Grid-invariant weights: constant index_map -> fetched once, not per step.
                pl.BlockSpec((Cin, Cin), lambda n, i: (0, 0)),                 # w1 (ci,co)
                pl.BlockSpec((9, Cin), lambda n, i: (0, 0)),                   # depthwise taps
                pl.BlockSpec((Cin, Cout), lambda n, i: (0, 0)),                # w2 (ci,co)
                pl.BlockSpec((1, Cout), lambda n, i: (0, 0)),                  # folded bias
            ],
            out_specs=pl.BlockSpec((1, tile_h, W_pad, Cout), lambda n, i: (n, i, 0, 0)),
            scratch_shapes=[pltpu.VMEM(((tile_h + 2) * W_pad, Cin), jnp.float32)],
        ),
        compiler_params=pltpu.CompilerParams(
            # Every grid step is independent -> shardable across v7x's 2 TensorCores.
            dimension_semantics=("parallel", "parallel"),
            vmem_limit_bytes=int(vmem_limit_bytes),
        ),
    )(x_p, x_p, x_p, w1k, wd9, w2k, b2p)

    if H_pad != H or W_pad != W:
        out = out[:, :H, :W, :]
    return out


def repconv_pallas(x_nchw, folded_params, tile_h=None, tap_dtype=jnp.float32):
    # TODO(synk): prefer repconv_pallas_nhwc end-to-end; these NCHW<->NHWC transposes
    #             are extra HBM-bound passes kept only for PyTorch-layout parity.
    x = jnp.transpose(x_nchw, (0, 2, 3, 1))
    out = repconv_pallas_nhwc(x, folded_params, tile_h=tile_h, tap_dtype=tap_dtype)
    return jnp.transpose(out, (0, 3, 1, 2))


# --------------------------------------------------------------------------------------
# Parameter folding (eval-mode BN) and pure-JAX reference
# --------------------------------------------------------------------------------------
def fold_repconv_params(raw, eps=1e-5, matmul_dtype=jnp.float32):
    """Fold BN scales into the 1x1 weights and the constant-pad border term into the bias."""
    (w1, wd, w2, g1, be1, rm1, rv1, g2, be2, rm2, rv2) = raw
    cin, cout = w1.shape[0], w2.shape[0]
    s1 = g1 / jnp.sqrt(rv1 + eps)
    b1 = be1 - rm1 * s1                     # == BNAndPadLayer pad value (conv1x1 has no bias)
    s2 = g2 / jnp.sqrt(rv2 + eps)
    b2 = be2 - rm2 * s2
    w1k = (w1.T * s1[None, :]).astype(matmul_dtype)      # (ci, co), BN1 scale folded
    w2k = (w2.T * s2[None, :]).astype(matmul_dtype)      # (ci, co), BN2 scale folded
    wd9 = jnp.transpose(wd, (1, 2, 0)).reshape(9, cin)   # (kh*kw, c)
    # depthwise(pad_const(y, b1)) == depthwise(pad_zero(y - b1)) + b1 * sum(wd); since
    # (y - b1) is exactly the scaled bias-free 1x1 conv, only the additive term survives
    # and it folds through the second 1x1 into the bias.  Use the *cast* w2k so the bias
    # matches what the kernel actually multiplies on the bf16 path.
    wdsum = jnp.sum(wd, axis=(1, 2))                     # (c,)
    b2p = b2 + (b1 * wdsum) @ w2k.astype(jnp.float32)    # (cout,)
    return (w1k, wd9.astype(jnp.float32), w2k,
            b2p.astype(jnp.float32).reshape(1, cout))


def repconv_reference(x_nchw, raw_params, eps=1e-5):
    """Pure-JAX NCHW reference following the PyTorch eval-mode forward op-by-op."""
    (w1, wd, w2, g1, be1, rm1, rv1, g2, be2, rm2, rv2) = raw_params
    N, C, H, W = x_nchw.shape
    Co = w2.shape[0]
    y = jnp.einsum('nchw,dc->ndhw', x_nchw, w1)                        # conv1x1, no bias
    s1 = g1 / jnp.sqrt(rv1 + eps)
    b1 = be1 - rm1 * s1
    y = y * s1.reshape(1, C, 1, 1) + b1.reshape(1, C, 1, 1)            # BN1 (eval)
    pad_val = b1.reshape(1, C, 1, 1)                                   # BNAndPad: border = b1
    yp = jnp.pad(y - pad_val, ((0, 0), (0, 0), (1, 1), (1, 1))) + pad_val
    acc = jnp.zeros_like(y)
    for dh in range(3):                                                # depthwise 3x3, valid
        for dw in range(3):
            acc = acc + yp[:, :, dh:dh + H, dw:dw + W] * wd[:, dh, dw].reshape(1, C, 1, 1)
    z = jnp.einsum('nchw,dc->ndhw', acc, w2)                           # pointwise 1x1
    s2 = g2 / jnp.sqrt(rv2 + eps)
    b2 = be2 - rm2 * s2
    return z * s2.reshape(1, Co, 1, 1) + b2.reshape(1, Co, 1, 1)       # BN2 (eval)


def init_raw_params(key, cin, cout):
    ks = jax.random.split(key, 11)
    w1 = jax.random.normal(ks[0], (cin, cin), jnp.float32) * 0.3       # Conv2d(cin,cin,1)
    wd = jax.random.normal(ks[1], (cin, 3, 3), jnp.float32) * 0.3      # depthwise (c,kh,kw)
    w2 = jax.random.normal(ks[2], (cout, cin), jnp.float32) * 0.3      # Conv2d(cin,cout,1)
    g1 = jax.random.uniform(ks[3], (cin,), jnp.float32, 0.5, 1.5)
    be1 = jax.random.normal(ks[4], (cin,), jnp.float32) * 0.1
    rm1 = jax.random.normal(ks[5], (cin,), jnp.float32) * 0.1
    rv1 = jax.random.uniform(ks[6], (cin,), jnp.float32, 0.5, 1.5)
    g2 = jax.random.uniform(ks[7], (cout,), jnp.float32, 0.5, 1.5)
    be2 = jax.random.normal(ks[8], (cout,), jnp.float32) * 0.1
    rm2 = jax.random.normal(ks[9], (cout,), jnp.float32) * 0.1
    rv2 = jax.random.uniform(ks[10], (cout,), jnp.float32, 0.5, 1.5)
    return (w1, wd, w2, g1, be1, rm1, rv1, g2, be2, rm2, rv2)


if __name__ == "__main__":
    key = jax.random.PRNGKey(0)
    k_x, k_p = jax.random.split(key)

    N, Cin, Cout, H, W = 2, 4, 8, 16, 16
    x = jax.random.normal(k_x, (N, Cin, H, W), jnp.float32)            # NCHW like PyTorch
    raw = init_raw_params(k_p, Cin, Cout)

    ref = jax.block_until_ready(repconv_reference(x, raw))

    folded_f32 = fold_repconv_params(raw, matmul_dtype=jnp.float32)

    # (a) f32 path, explicitly exercising the halo row-tiling: 2 tiles of 8 rows.
    out_a = jax.block_until_ready(repconv_pallas(x, folded_f32, tile_h=8))
    np.testing.assert_allclose(np.asarray(out_a), np.asarray(ref), rtol=1e-4, atol=1e-4)

    # (b) f32 path, ragged last tile: 16 rows as 3 tiles of 6 (2 zero-padded rows).
    out_b = jax.block_until_ready(repconv_pallas(x, folded_f32, tile_h=6))
    np.testing.assert_allclose(np.asarray(out_b), np.asarray(ref), rtol=1e-4, atol=1e-4)

    # (c) bf16 activations end-to-end + bf16 MXU weights + bf16 tap multiplies,
    #     generation-aware auto tile pick.
    folded_bf16 = fold_repconv_params(raw, matmul_dtype=jnp.bfloat16)
    x_bf16 = jnp.transpose(x, (0, 2, 3, 1)).astype(jnp.bfloat16)       # NHWC, bf16 I/O
    out_c = repconv_pallas_nhwc(x_bf16, folded_bf16, tap_dtype=jnp.bfloat16)
    out_c = jax.block_until_ready(jnp.transpose(out_c, (0, 3, 1, 2)))
    np.testing.assert_allclose(np.asarray(out_c.astype(jnp.float32)), np.asarray(ref),
                               rtol=1e-1, atol=2e-1)

    print("KERNEL_OK")
</pallas_src>

<mosaic_0001>
module attributes {stable_mosaic.version = 11 : i64} {
  func.func @repconv_kernel(%arg0: i32, %arg1: i32, %arg2: memref<1x1x16x4xf32, #tpu.memory_space<vmem>>, %arg3: memref<1x8x16x4xf32, #tpu.memory_space<vmem>>, %arg4: memref<1x1x16x4xf32, #tpu.memory_space<vmem>>, %arg5: memref<4x4xf32, #tpu.memory_space<vmem>>, %arg6: memref<9x4xf32, #tpu.memory_space<vmem>>, %arg7: memref<4x8xf32, #tpu.memory_space<vmem>>, %arg8: memref<1x8xf32, #tpu.memory_space<vmem>>, %arg9: memref<1x8x16x8xf32, #tpu.memory_space<vmem>>, %arg10: memref<160x4xf32, #tpu.memory_space<vmem>>) attributes {dimension_semantics = [#tpu.dimension_semantics<parallel>, #tpu.dimension_semantics<parallel>], iteration_bounds = array<i64: 2, 2>, scalar_prefetch = 0 : i64, scratch_operands = 1 : i64, tpu.core_type = #tpu.core_type<tc>, window_params = [{transform_indices = @transform_0, window_bounds = array<i64: 1, 1, 16, 4>}, {transform_indices = @transform_1, window_bounds = array<i64: 1, 8, 16, 4>}, {transform_indices = @transform_2, window_bounds = array<i64: 1, 1, 16, 4>}, {pipeline_mode = #tpu.pipeline_mode<synchronous>, transform_indices = @transform_3, window_bounds = array<i64: 4, 4>}, {pipeline_mode = #tpu.pipeline_mode<synchronous>, transform_indices = @transform_4, window_bounds = array<i64: 9, 4>}, {pipeline_mode = #tpu.pipeline_mode<synchronous>, transform_indices = @transform_5, window_bounds = array<i64: 4, 8>}, {pipeline_mode = #tpu.pipeline_mode<synchronous>, transform_indices = @transform_6, window_bounds = array<i64: 1, 8>}, {transform_indices = @transform_7, window_bounds = array<i64: 1, 8, 16, 8>}]} {
    %c0 = arith.constant 0 : index
    %c0_0 = arith.constant 0 : index
    %c0_1 = arith.constant 0 : index
    %c0_2 = arith.constant 0 : index
    %0 = vector.load %arg3[%c0, %c0_0, %c0_1, %c0_2] : memref<1x8x16x4xf32, #tpu.memory_space<vmem>>, vector<1x8x16x4xf32>
    %1 = vector.shape_cast %0 : vector<1x8x16x4xf32> to vector<8x16x4xf32>
    %2 = vector.shape_cast %1 : vector<8x16x4xf32> to vector<128x4xf32>
    %c0_3 = arith.constant 0 : index
    %c0_4 = arith.constant 0 : index
    %3 = vector.load %arg5[%c0_3, %c0_4] : memref<4x4xf32, #tpu.memory_space<vmem>>, vector<4x4xf32>
    %cst = arith.constant dense<0.000000e+00> : vector<128x4xf32>
    %4 = tpu.matmul %2, %3, %cst {dimension_numbers = #tpu.dot_dimension_numbers<[1], [0], [0], [1], [0, 0, 1, 1], [], []>} : vector<128x4xf32>, vector<4x4xf32>, vector<128x4xf32> -> vector<128x4xf32>
    %c16 = arith.constant 16 : index
    %c0_5 = arith.constant 0 : index
    %5 = vector.load %arg10[%c16, %c0_5] : memref<160x4xf32, #tpu.memory_space<vmem>>, vector<128x4xf32>
    tpu.vector_store %arg10[%c16, %c0_5], %4 {strides = array<i32>} : memref<160x4xf32, #tpu.memory_space<vmem>>, vector<128x4xf32>,
    %c0_i32 = arith.constant 0 : i32
    %6 = arith.cmpi sgt, %arg1, %c0_i32 : i32
    %c0_6 = arith.constant 0 : index
    %c0_7 = arith.constant 0 : index
    %c0_8 = arith.constant 0 : index
    %c0_9 = arith.constant 0 : index
    %7 = vector.load %arg2[%c0_6, %c0_7, %c0_8, %c0_9] : memref<1x1x16x4xf32, #tpu.memory_space<vmem>>, vector<1x1x16x4xf32>
    %8 = vector.shape_cast %7 : vector<1x1x16x4xf32> to vector<16x4xf32>
    %c0_i32_10 = arith.constant 0 : i32
    %9 = arith.sitofp %c0_i32_10 : i32 to f32
    %10 = vector.broadcast %9 : f32 to vector<16x4xf32>
    %11 = arith.select %6, %8, %10 : vector<16x4xf32>
    %c1_i32 = arith.constant 1 : i32
    %12 = arith.cmpi slt, %arg1, %c1_i32 : i32
    %c0_11 = arith.constant 0 : index
    %c0_12 = arith.constant 0 : index
    %c0_13 = arith.constant 0 : index
    %c0_14 = arith.constant 0 : index
    %13 = vector.load %arg4[%c0_11, %c0_12, %c0_13, %c0_14] : memref<1x1x16x4xf32, #tpu.memory_space<vmem>>, vector<1x1x16x4xf32>
    %14 = vector.shape_cast %13 : vector<1x1x16x4xf32> to vector<16x4xf32>
    %c0_i32_15 = arith.constant 0 : i32
    %15 = arith.sitofp %c0_i32_15 : i32 to f32
    %16 = vector.broadcast %15 : f32 to vector<16x4xf32>
    %17 = arith.select %12, %14, %16 : vector<16x4xf32>
    %c0_16 = arith.constant 0 : index
    %c0_17 = arith.constant 0 : index
    %18 = vector.load %arg5[%c0_16, %c0_17] : memref<4x4xf32, #tpu.memory_space<vmem>>, vector<4x4xf32>
    %cst_18 = arith.constant dense<0.000000e+00> : vector<16x4xf32>
    %19 = tpu.matmul %11, %18, %cst_18 {dimension_numbers = #tpu.dot_dimension_numbers<[1], [0], [0], [1], [0, 0, 1, 1], [], []>} : vector<16x4xf32>, vector<4x4xf32>, vector<16x4xf32> -> vector<16x4xf32>
    %c0_19 = arith.constant 0 : index
    %c0_20 = arith.constant 0 : index
    %20 = vector.load %arg10[%c0_19, %c0_20] : memref<160x4xf32, #tpu.memory_space<vmem>>, vector<16x4xf32>
    tpu.vector_store %arg10[%c0_19, %c0_20], %19 {strides = array<i32>} : memref<160x4xf32, #tpu.memory_space<vmem>>, vector<16x4xf32>,
    %c0_21 = arith.constant 0 : index
    %c0_22 = arith.constant 0 : index
    %21 = vector.load %arg5[%c0_21, %c0_22] : memref<4x4xf32, #tpu.memory_space<vmem>>, vector<4x4xf32>
    %cst_23 = arith.constant dense<0.000000e+00> : vector<16x4xf32>
    %22 = tpu.matmul %17, %21, %cst_23 {dimension_numbers = #tpu.dot_dimension_numbers<[1], [0], [0], [1], [0, 0, 1, 1], [], []>} : vector<16x4xf32>, vector<4x4xf32>, vector<16x4xf32> -> vector<16x4xf32>
    %c144 = arith.constant 144 : index
    %c0_24 = arith.constant 0 : index
    %23 = vector.load %arg10[%c144, %c0_24] : memref<160x4xf32, #tpu.memory_space<vmem>>, vector<16x4xf32>
    tpu.vector_store %arg10[%c144, %c0_24], %22 {strides = array<i32>} : memref<160x4xf32, #tpu.memory_space<vmem>>, vector<16x4xf32>,
    %c0_25 = arith.constant 0 : index
    %c0_26 = arith.constant 0 : index
    %24 = vector.load %arg10[%c0_25, %c0_26] : memref<160x4xf32, #tpu.memory_space<vmem>>, vector<160x4xf32>
    %25 = tpu.iota {dimensions = array<i32: 0>} : vector<160x1xi32>
    %c16_i32 = arith.constant 16 : i32
    %c0_i32_27 = arith.constant 0 : i32
    %26 = arith.cmpi eq, %c16_i32, %c0_i32_27 : i32
    %c1_i32_28 = arith.constant 1 : i32
    %27 = arith.select %26, %c1_i32_28, %c16_i32 : i32
    %28 = vector.broadcast %27 : i32 to vector<160x1xi32>
    %29 = arith.remsi %25, %28 : vector<160x1xi32>
    %c0_i32_29 = arith.constant 0 : i32
    %30 = vector.broadcast %c0_i32_29 : i32 to vector<160x1xi32>
    %31 = arith.cmpi ne, %29, %30 : vector<160x1xi32>
    %c0_i32_30 = arith.constant 0 : i32
    %32 = vector.broadcast %c0_i32_30 : i32 to vector<160x1xi32>
    %33 = arith.cmpi slt, %29, %32 : vector<160x1xi32>
    %c0_i32_31 = arith.constant 0 : i32
    %34 = arith.cmpi slt, %27, %c0_i32_31 : i32
    %35 = vector.broadcast %34 : i1 to vector<160x1xi1>
    %36 = vector.broadcast %35 : vector<160x1xi1> to vector<160x1xi1>
    %37 = arith.xori %33, %36 : vector<160x1xi1>
    %38 = arith.andi %37, %31 : vector<160x1xi1>
    %39 = vector.broadcast %27 : i32 to vector<160x1xi32>
    %40 = arith.addi %29, %39 : vector<160x1xi32>
    %41 = arith.select %38, %40, %29 : vector<160x1xi1>, vector<160x1xi32>
    %c0_i32_32 = arith.constant 0 : i32
    %42 = vector.broadcast %c0_i32_32 : i32 to vector<160x1xi32>
    %43 = arith.cmpi ne, %41, %42 : vector<160x1xi32>
    %44 = arith.extui %43 : vector<160x1xi1> to vector<160x1xi32>
    %45 = arith.sitofp %44 : vector<160x1xi32> to vector<160x1xf32>
    %c15_i32 = arith.constant 15 : i32
    %46 = vector.broadcast %c15_i32 : i32 to vector<160x1xi32>
    %47 = arith.cmpi ne, %41, %46 : vector<160x1xi32>
    %48 = arith.extui %47 : vector<160x1xi1> to vector<160x1xi32>
    %49 = arith.sitofp %48 : vector<160x1xi32> to vector<160x1xf32>
    %c1_i32_33 = arith.constant 1 : i32
    %50 = tpu.dynamic_rotate %24 by %c1_i32_33 dim 0 : vector<160x4xf32>, i32 -> vector<160x4xf32>
    %51 = vector.broadcast %45 : vector<160x1xf32> to vector<160x4xf32>
    %52 = arith.mulf %50, %51 : vector<160x4xf32>
    %c159_i32 = arith.constant 159 : i32
    %53 = tpu.dynamic_rotate %24 by %c159_i32 dim 0 : vector<160x4xf32>, i32 -> vector<160x4xf32>
    %54 = vector.broadcast %49 : vector<160x1xf32> to vector<160x4xf32>
    %55 = arith.mulf %53, %54 : vector<160x4xf32>
    %c0_34 = arith.constant 0 : index
    %c0_35 = arith.constant 0 : index
    %56 = vector.load %arg6[%c0_34, %c0_35] : memref<9x4xf32, #tpu.memory_space<vmem>>, vector<9x4xf32>
    %cst_36 = arith.constant 0.000000e+00 : f32
    %57 = vector.broadcast %cst_36 : f32 to vector<128x4xf32>
    %58 = vector.extract_strided_slice %52 {offsets = [0, 0], sizes = [128, 4], strides = [1, 1]} : vector<160x4xf32> to vector<128x4xf32>
    %59 = vector.extract_strided_slice %56 {offsets = [0, 0], sizes = [1, 4], strides = [1, 1]} : vector<9x4xf32> to vector<1x4xf32>
    %60 = vector.broadcast %59 : vector<1x4xf32> to vector<128x4xf32>
    %61 = arith.mulf %58, %60 : vector<128x4xf32>
    %62 = arith.addf %57, %61 : vector<128x4xf32>
    %63 = vector.extract_strided_slice %24 {offsets = [0, 0], sizes = [128, 4], strides = [1, 1]} : vector<160x4xf32> to vector<128x4xf32>
    %64 = vector.extract_strided_slice %56 {offsets = [1, 0], sizes = [1, 4], strides = [1, 1]} : vector<9x4xf32> to vector<1x4xf32>
    %65 = vector.broadcast %64 : vector<1x4xf32> to vector<128x4xf32>
    %66 = arith.mulf %63, %65 : vector<128x4xf32>
    %67 = arith.addf %62, %66 : vector<128x4xf32>
    %68 = vector.extract_strided_slice %55 {offsets = [0, 0], sizes = [128, 4], strides = [1, 1]} : vector<160x4xf32> to vector<128x4xf32>
    %69 = vector.extract_strided_slice %56 {offsets = [2, 0], sizes = [1, 4], strides = [1, 1]} : vector<9x4xf32> to vector<1x4xf32>
    %70 = vector.broadcast %69 : vector<1x4xf32> to vector<128x4xf32>
    %71 = arith.mulf %68, %70 : vector<128x4xf32>
    %72 = arith.addf %67, %71 : vector<128x4xf32>
    %73 = vector.extract_strided_slice %52 {offsets = [16, 0], sizes = [128, 4], strides = [1, 1]} : vector<160x4xf32> to vector<128x4xf32>
    %74 = vector.extract_strided_slice %56 {offsets = [3, 0], sizes = [1, 4], strides = [1, 1]} : vector<9x4xf32> to vector<1x4xf32>
    %75 = vector.broadcast %74 : vector<1x4xf32> to vector<128x4xf32>
    %76 = arith.mulf %73, %75 : vector<128x4xf32>
    %77 = arith.addf %72, %76 : vector<128x4xf32>
    %78 = vector.extract_strided_slice %24 {offsets = [16, 0], sizes = [128, 4], strides = [1, 1]} : vector<160x4xf32> to vector<128x4xf32>
    %79 = vector.extract_strided_slice %56 {offsets = [4, 0], sizes = [1, 4], strides = [1, 1]} : vector<9x4xf32> to vector<1x4xf32>
    %80 = vector.broadcast %79 : vector<1x4xf32> to vector<128x4xf32>
    %81 = arith.mulf %78, %80 : vector<128x4xf32>
    %82 = arith.addf %77, %81 : vector<128x4xf32>
    %83 = vector.extract_strided_slice %55 {offsets = [16, 0], sizes = [128, 4], strides = [1, 1]} : vector<160x4xf32> to vector<128x4xf32>
    %84 = vector.extract_strided_slice %56 {offsets = [5, 0], sizes = [1, 4], strides = [1, 1]} : vector<9x4xf32> to vector<1x4xf32>
    %85 = vector.broadcast %84 : vector<1x4xf32> to vector<128x4xf32>
    %86 = arith.mulf %83, %85 : vector<128x4xf32>
    %87 = arith.addf %82, %86 : vector<128x4xf32>
    %88 = vector.extract_strided_slice %52 {offsets = [32, 0], sizes = [128, 4], strides = [1, 1]} : vector<160x4xf32> to vector<128x4xf32>
    %89 = vector.extract_strided_slice %56 {offsets = [6, 0], sizes = [1, 4], strides = [1, 1]} : vector<9x4xf32> to vector<1x4xf32>
    %90 = vector.broadcast %89 : vector<1x4xf32> to vector<128x4xf32>
    %91 = arith.mulf %88, %90 : vector<128x4xf32>
    %92 = arith.addf %87, %91 : vector<128x4xf32>
    %93 = vector.extract_strided_slice %24 {offsets = [32, 0], sizes = [128, 4], strides = [1, 1]} : vector<160x4xf32> to vector<128x4xf32>
    %94 = vector.extract_strided_slice %56 {offsets = [7, 0], sizes = [1, 4], strides = [1, 1]} : vector<9x4xf32> to vector<1x4xf32>
    %95 = vector.broadcast %94 : vector<1x4xf32> to vector<128x4xf32>
    %96 = arith.mulf %93, %95 : vector<128x4xf32>
    %97 = arith.addf %92, %96 : vector<128x4xf32>
    %98 = vector.extract_strided_slice %55 {offsets = [32, 0], sizes = [128, 4], strides = [1, 1]} : vector<160x4xf32> to vector<128x4xf32>
    %99 = vector.extract_strided_slice %56 {offsets = [8, 0], sizes = [1, 4], strides = [1, 1]} : vector<9x4xf32> to vector<1x4xf32>
    %100 = vector.broadcast %99 : vector<1x4xf32> to vector<128x4xf32>
    %101 = arith.mulf %98, %100 : vector<128x4xf32>
    %102 = arith.addf %97, %101 : vector<128x4xf32>
    %c0_37 = arith.constant 0 : index
    %c0_38 = arith.constant 0 : index
    %103 = vector.load %arg7[%c0_37, %c0_38] : memref<4x8xf32, #tpu.memory_space<vmem>>, vector<4x8xf32>
    %cst_39 = arith.constant dense<0.000000e+00> : vector<128x8xf32>
    %104 = tpu.matmul %102, %103, %cst_39 {dimension_numbers = #tpu.dot_dimension_numbers<[1], [0], [0], [1], [0, 0, 1, 1], [], []>} : vector<128x4xf32>, vector<4x8xf32>, vector<128x8xf32> -> vector<128x8xf32>
    %c0_40 = arith.constant 0 : index
    %c0_41 = arith.constant 0 : index
    %105 = vector.load %arg8[%c0_40, %c0_41] : memref<1x8xf32, #tpu.memory_space<vmem>>, vector<1x8xf32>
    %106 = vector.broadcast %105 : vector<1x8xf32> to vector<128x8xf32>
    %107 = arith.addf %104, %106 : vector<128x8xf32>
    %108 = vector.shape_cast %107 : vector<128x8xf32> to vector<8x16x8xf32>
    %c0_42 = arith.constant 0 : index
    %c0_43 = arith.constant 0 : index
    %c0_44 = arith.constant 0 : index
    %c0_45 = arith.constant 0 : index
    %109 = vector.load %arg9[%c0_42, %c0_43, %c0_44, %c0_45] : memref<1x8x16x8xf32, #tpu.memory_space<vmem>>, vector<1x8x16x8xf32>
    %110 = vector.shape_cast %109 : vector<1x8x16x8xf32> to vector<8x16x8xf32>
    %111 = vector.shape_cast %108 : vector<8x16x8xf32> to vector<1x8x16x8xf32>
    tpu.vector_store %arg9[%c0_42, %c0_43, %c0_44, %c0_45], %111 {strides = array<i32>} : memref<1x8x16x8xf32, #tpu.memory_space<vmem>>, vector<1x8x16x8xf32>,
    return
  }
  func.func @transform_0(%arg0: i32, %arg1: i32) -> (i32, i32, i32, i32) {
    %c8_i32 = arith.constant 8 : i32
    %0 = arith.muli %arg1, %c8_i32 : i32
    %c1_i32 = arith.constant 1 : i32
    %1 = arith.subi %0, %c1_i32 : i32
    %c0_i32 = arith.constant 0 : i32
    %2 = arith.maxsi %1, %c0_i32 : i32
    %c0_i32_0 = arith.constant 0 : i32
    %c0_i32_1 = arith.constant 0 : i32
    %c0_i32_2 = arith.constant 0 : i32
    return %arg0, %2, %c0_i32_0, %c0_i32_1 : i32, i32, i32, i32
  }
  func.func @transform_1(%arg0: i32, %arg1: i32) -> (i32, i32, i32, i32) {
    %c0_i32 = arith.constant 0 : i32
    %c0_i32_0 = arith.constant 0 : i32
    %c0_i32_1 = arith.constant 0 : i32
    return %arg0, %arg1, %c0_i32, %c0_i32_0 : i32, i32, i32, i32
  }
  func.func @transform_2(%arg0: i32, %arg1: i32) -> (i32, i32, i32, i32) {
    %c8_i32 = arith.constant 8 : i32
    %0 = arith.muli %arg1, %c8_i32 : i32
    %c8_i32_0 = arith.constant 8 : i32
    %1 = arith.addi %0, %c8_i32_0 : i32
    %c15_i32 = arith.constant 15 : i32
    %2 = arith.minsi %1, %c15_i32 : i32
    %c0_i32 = arith.constant 0 : i32
    %c0_i32_1 = arith.constant 0 : i32
    %c0_i32_2 = arith.constant 0 : i32
    return %arg0, %2, %c0_i32, %c0_i32_1 : i32, i32, i32, i32
  }
  func.func @transform_3(%arg0: i32, %arg1: i32) -> (i32, i32) {
    %c0_i32 = arith.constant 0 : i32
    %c0_i32_0 = arith.constant 0 : i32
    %c0_i32_1 = arith.constant 0 : i32
    return %c0_i32, %c0_i32_0 : i32, i32
  }
  func.func @transform_4(%arg0: i32, %arg1: i32) -> (i32, i32) {
    %c0_i32 = arith.constant 0 : i32
    %c0_i32_0 = arith.constant 0 : i32
    %c0_i32_1 = arith.constant 0 : i32
    return %c0_i32, %c0_i32_0 : i32, i32
  }
  func.func @transform_5(%arg0: i32, %arg1: i32) -> (i32, i32) {
    %c0_i32 = arith.constant 0 : i32
    %c0_i32_0 = arith.constant 0 : i32
    %c0_i32_1 = arith.constant 0 : i32
    return %c0_i32, %c0_i32_0 : i32, i32
  }
  func.func @transform_6(%arg0: i32, %arg1: i32) -> (i32, i32) {
    %c0_i32 = arith.constant 0 : i32
    %c0_i32_0 = arith.constant 0 : i32
    %c0_i32_1 = arith.constant 0 : i32
    return %c0_i32, %c0_i32_0 : i32, i32
  }
  func.func @transform_7(%arg0: i32, %arg1: i32) -> (i32, i32, i32, i32) {
    %c0_i32 = arith.constant 0 : i32
    %c0_i32_0 = arith.constant 0 : i32
    %c0_i32_1 = arith.constant 0 : i32
    return %arg0, %arg1, %c0_i32, %c0_i32_0 : i32, i32, i32, i32
  }
}

</mosaic_0001>

<bundles_post_ra>
// kernel: tpu_custom_call.1
= control target key start
LH: loop header
LB: loop body
LE: loop exit
PB: predicated region body
PF: predicated region fallthrough
CT: control target
= control target key end

     0   :  { %s2417_s24 = smov 0   ;;  %s2419_s25 = smov 0   ;;  %s3373_s0 = inlined_call_operand.vmem [shape: f32[2,16,16,4], index: 0, kind: input, shape index: {}]   ;;  %s3374_s1 = inlined_call_operand.vmem [shape: f32[2,16,16,4], index: 1, kind: input, shape index: {}]   ;;  %s3375_s2 = inlined_call_operand.vmem [shape: f32[2,16,16,4], index: 2, kind: input, shape index: {}]   ;;  %s3376_s3 = inlined_call_operand.vmem [shape: f32[4,4], index: 3, kind: input, shape index: {}]   ;;  %s3377_s4 = inlined_call_operand.vmem [shape: f32[9,4], index: 4, kind: input, shape index: {}]   ;;  %s3378_s5 = inlined_call_operand.vmem [shape: f32[4,8], index: 5, kind: input, shape index: {}]   ;;  %s3379_s6 = inlined_call_operand.vmem [shape: f32[1,8], index: 6, kind: input, shape index: {}]   ;;  %s3380_s7 = inlined_call_operand.vmem [shape: f32[2,16,16,8], index: 7, kind: output, shape index: {}]  }
   0x1   :  { %s2421_s26 = smov 0   ;;  %s2423_s27 = smov 0  }
   0x2   :  { %s2425_s28 = smov 0  }
   0x3 LB: > { %s26_s29 = sadd.s32 1, %s2366_s26  ;;  %s29_s30 = sadd.s32 1, %s2370_s27  ;;  %s2374_s28 = sphi %s2425_s28, %s17_s28   ;;  %s2370_s27 = sphi %s2423_s27, %s3471_s27   ;;  %s2366_s26 = sphi %s2421_s26, %s3470_s26   ;;  %s2362_s25 = sphi %s2419_s25, %s3469_s25   ;;  %s2358_s24 = sphi %s2417_s24, %s3468_s24  }
   0x4   : > { %p27_p0 = scmp.ge.s32.totalorder %s26_s29, 2  ;;  %p2089_p1 = scmp.ge.s32.totalorder %s2374_s28, 1 }
   0x5   : > { %p323_p2 = scmp.lt.s32.totalorder %s2374_s28, 5 }
   0x6   : > { %s3473_s29 = smov (%p27_p0, %s26_s29), 0  ;;  %s3475_s30 = smov (!%p27_p0, %s29_s30), %s2370_s27 }
   0x7   : > { %p324_p3 = pnand %p2089_p1, %p323_p2  ;;  %p31_p4 = scmp.ge.s32.totalorder %s3475_s30, 2 }
   0x9   : > { %s3477_s30 = smov (%p31_p4, %s3475_s30), 0  ;;  %327 = sbr.rel (%p324_p3) target bundleno = 566 (0x236), region = 48 }
  0x10   : > { %v463_v0 = vld [vmem:[%s3376_s3] sm:$0xf]  ;;  %vm513_vm0 = vcmask 1043456   ;;  %s2090_s10 = sshll.u32 %s2358_s24, 3  ;;  %p395_p5 = scmp.lt.s32.totalorder %s2362_s25, 1  ;;  %vm464_vm1 = vcmask 31744   ;;  %v888_v24 = vlaneseq }
  0x11   : > { %2221 = vmatprep.subr.msk.mxu0 %vm513_vm0, %v463_v0  ;;  %p411_p6 = scmp.lt.s32.totalorder %s2090_s10, 15  ;;  %v694_v1 = vld [vmem:[%s3376_s3] sm:$0xf]  ;;  %s420_s15 = sadd.s32 8, %s2090_s10  ;;  %v2376_v58 = vmov 0.0  }
  0x12   : > { %v781_v2 = vld [vmem:[%s3376_s3] sm:$0xf]  ;;  %2222 = vmatpush3.msk.msra.mxu0 %vm513_vm0, %v463_v0  ;;  %s3479_s25 = smov (!%p395_p5, %s2362_s25), 1  ;;  %p2466_p7 = scmp.lt.s32.totalorder %s420_s15, 15  ;;  %v2550_v25 = vshrl.u32 %v888_v24, 7 }
  0x13   : > { %2252 = vmatprep.subr.msk.mxu1 %vm513_vm0, %v781_v2  ;;  %s412_s16 = scalar_select %p411_p6, %s2090_s10, 15  ;;  %2247 = vmatprep.subr.msk.mxu0 %vm513_vm0, %v694_v1  ;;  %v1717_v23 = vld [vmem:[%s3378_s5] sm:$0xf] }
  0x14   : > { %2253 = vmatpush3.msk.msra.mxu1 %vm513_vm0, %v781_v2  ;;  %s2464_s17 = sshll.u32 %s3479_s25, 5  ;;  %p686_p8 = scmp.lt.s32.totalorder %s2358_s24, 1  ;;  %v893_v26 = vadd.s32 32, %v2550_v25  ;;  %v892_v27 = vadd.s32 24, %v2550_v25  ;;  %v894_v28 = vadd.s32 40, %v2550_v25  ;;  %v1431_v29 = vsub.s32 1, %v2550_v25 }
  0x15   : > { %s2101_s18 = sshll.u32 %s412_s16, 1  ;;  %s2482_s8 = sadd.s32 4294967295, %s2090_s10  ;;  %2257 = vmatprep.subr.msk.mxu1 %vm513_vm0, %v1717_v23  ;;  %v1539_v30 = vsub.s32 4, %v2550_v25  ;;  %v895_v31 = vadd.s32 48, %v2550_v25  ;;  %v1391_v32 = vld [vmem:[%s3377_s4] sm:$0xff]  ;;  %v1395_v34 = vsub.s32 0, %v2550_v25 }
  0x16   : > { %s2471_s20 = sadd.s32 %s2101_s18, %s2464_s17  ;;  %s3481_s15 = smov (!%p2466_p7, %s420_s15), 15  ;;  %v941_v33 = vand.u32 15, %v893_v26  ;;  %v934_v35 = vand.u32 15, %v892_v27  ;;  %v948_v36 = vand.u32 15, %v894_v28  ;;  %v896_v37 = vadd.s32 56, %v2550_v25 }
  0x17   : > { %s2103_s21 = sshll.u32 %s2471_s20, 3  ;;  %s3483_s15 = smov (!%p2466_p7, %s3481_s15), 15  ;;  %v2563_v38 = vrot.slane %v1391_v32, %v1431_v29  ;;  %v2565_v39 = vrot.slane %v1391_v32, %v1539_v30  ;;  %v955_v40 = vand.u32 15, %v895_v31  ;;  %v1467_v41 = vsub.s32 2, %v2550_v25 }
  0x18   : > { %s2480_s25 = scalar_lea.vmem %s3374_s1, %s2103_s21  ;;  %p393_p9 = scmp.gt.s32.totalorder %s2482_s8, 0  ;;  %v1503_v42 = vsub.s32 3, %v2550_v25  ;;  %v1575_v43 = vsub.s32 5, %v2550_v25  ;;  %v1647_v44 = vsub.s32 7, %v2550_v25  ;;  %vm2571_vm2 = vcmp.ne.s32.totalorder %v941_v33, 0 }
  0x19   : > { %v447_v3 = vld [vmem:[%s2480_s25] sm:$0xff]  ;;  %v448_v4 = vld [vmem:[%s2480_s25 + $0x8] sm:$0xff]  ;;  %v449_v5 = vld [vmem:[%s2480_s25 + $0x10] sm:$0xff]  ;;  %s2108_s9 = sshll.u32 %s3483_s15, 1  ;;  %p2092_p10 = scmp.lt.s32.totalorder %s2482_s8, 15  ;;  %v2575_v46 = vrot.slane %v1391_v32, %v1395_v34  ;;  %v1611_v47 = vsub.s32 6, %v2550_v25  ;;  %v2586_v54 = vrot.slane %v1391_v32, %v1467_v41 }
  0x1a   : > { %2223 = vmatprep.mubr.msk.f32.mxu0 %vm464_vm1, %v447_v3  ;;  %v450_v6 = vld [vmem:[%s2480_s25 + $0x18] sm:$0xff]  ;;  %v451_v7 = vld [vmem:[%s2480_s25 + $0x20] sm:$0xff]  ;;  %s429_s10 = sadd.s32 %s2108_s9, %s2464_s17  ;;  %v452_v8 = vld [vmem:[%s2480_s25 + $0x28] sm:$0xff]  ;;  %p678_p11 = scmp.gt.s32.totalorder %s2358_s24, 0  ;;  %vm1212_vm3 = vcmp.ne.s32.totalorder %v934_v35, 15  ;;  %vm2578_vm4 = vcmp.ne.s32.totalorder %v948_v36, 15  ;;  %v2588_v55 = vrot.slane %v1391_v32, %v1503_v42  ;;  %v2590_v56 = vrot.slane %v1391_v32, %v1575_v43 }
  0x1b   : > { %2224 = vmatmul.mubr.msk.f32.vlgmr.msra.gmra.mrb[0].mxu0 %vm464_vm1, %v448_v4  ;;  %s2110_s11 = sshll.u32 %s429_s10, 3  ;;  %v453_v9 = vld [vmem:[%s2480_s25 + $0x30] sm:$0xff]  ;;  %v454_v11 = vld [vmem:[%s2480_s25 + $0x38] sm:$0xff]  ;;  %v455_v13 = vld [vmem:[%s2480_s25 + $0x40] sm:$0xff]  ;;  %v962_v49 = vand.u32 15, %v896_v37  ;;  %v897_v50 = vadd.s32 64, %v2550_v25  ;;  %v2592_v57 = vrot.slane %v1391_v32, %v1647_v44  ;;  %v2602_v61 = vrot.slane %v1391_v32, %v1611_v47 }
  0x1c   : > { %2248 = vmatpush3.msk.msra.mxu0 %vm513_vm0, %v694_v1  ;;  %2226 = vmatprep.mubr.msk.f32.mxu0 %vm464_vm1, %v449_v5  ;;  %s431_s14 = scalar_lea.vmem %s3375_s2, %s2110_s11  ;;  %v456_v14 = vld [vmem:[%s2480_s25 + $0x48] sm:$0xff]  ;;  %v457_v15 = vld [vmem:[%s2480_s25 + $0x50] sm:$0xff]  ;;  %v458_v16 = vld [vmem:[%s2480_s25 + $0x58] sm:$0xff]  ;;  %v890_v51 = vadd.s32 8, %v2550_v25  ;;  %v891_v52 = vadd.s32 16, %v2550_v25  ;;  %vm1155_vm5 = vcmp.ne.s32.totalorder %v955_v40, 0 }
  0x1d   : > { %s2325_s15 = scalar_select %p686_p8, 255, 0  ;;  %v459_v17 = vld [vmem:[%s2480_s25 + $0x60] sm:$0xff]  ;;  %v460_v18 = vld [vmem:[%s2480_s25 + $0x68] sm:$0xff]  ;;  %v461_v19 = vld [vmem:[%s2480_s25 + $0x70] sm:$0xff]  ;;  %v898_v53 = vadd.s32 72, %v2550_v25 }
  0x1e   : > { %s394_s16 = scalar_select %p393_p9, %s2482_s8, 0  ;;  %v462_v20 = vld [vmem:[%s2480_s25 + $0x78] sm:$0xff]  ;;  %v2597_v59 = vsel %vm2571_vm2, 1.0, %v2376_v58  ;;  %v2600_v60 = vsel %vm1212_vm3, 1.0, %v2376_v58  ;;  %v899_v62 = vadd.s32 80, %v2550_v25  ;;  %v2608_v63 = vsel %vm2578_vm4, 1.0, %v2376_v58 }
  0x1f   : > { %2227 = vmatmul.mubr.msk.f32.gmra.mrb[2].mxu0 %vm464_vm1, %v450_v6  ;;  %v2326_v10 = vld [vmem:[%s431_s14] sm:%s2325_s15]  ;;  %v2329_v12 = vld [vmem:[%s431_s14 + $0x8] sm:%s2325_s15]  ;;  %s2331_s23 = scalar_select %p678_p11, 255, 0  ;;  %v2611_v0 = vsel %vm1155_vm5, 1.0, %v2376_v58  ;;  %vm2613_vm6 = vcmp.ne.s32.totalorder %v962_v49, 15 }
  0x20   : > { %2229 = vmatprep.mubr.msk.f32.mxu0 %vm464_vm1, %v451_v7  ;;  %2254 = vmatprep.mubr.msk.f32.mxu1 %vm464_vm1, %v2326_v10  ;;  %s3485_s16 = smov (!%p2092_p10, %s394_s16), 15  ;;  %v969_v2 = vand.u32 15, %v897_v50  ;;  %v920_v3 = vand.u32 15, %v890_v51  ;;  %v927_v4 = vand.u32 15, %v891_v52  ;;  %v976_v5 = vand.u32 15, %v898_v53 }
  0x21   : > { %2255 = vmatmul.mubr.msk.f32.vlgmr.msra.gmra.mrb[0].mxu1 %vm464_vm1, %v2329_v12  ;;  %s2097_s18 = sshll.u32 %s3485_s16, 1  ;;  %v900_v6 = vadd.s32 88, %v2550_v25  ;;  %v902_v10 = vadd.s32 104, %v2550_v25  ;;  %vm1350_vm7 = vcmp.lt.s32.totalorder %v2550_v25, 7  ;;  %vm1289_vm13 = vcmp.lt.s32.totalorder %v2550_v25, 1 }
  0x22   : > { %s401_s19 = sadd.s32 %s2464_s17, %s2097_s18  ;;  %2258 = vmatpush3.msk.msra.mxu1 %vm513_vm0, %v1717_v23  ;;  %vm2633_vm8 = vcmp.ne.s32.totalorder %v969_v2, 0  ;;  %vm2639_vm9 = vcmp.ne.s32.totalorder %v927_v4, 0  ;;  %vm2643_vm10 = vcmp.ne.s32.totalorder %v920_v3, 15  ;;  %vm2647_vm11 = vcmp.ne.s32.totalorder %v976_v5, 15  ;;  %v2827_v3 = vld [vmem:[%s3377_s4 + $0x8] ss:$0 sm:$0xff] }
  0x23   : > { %2230 = vmatmul.mubr.msk.f32.gmra.mrb[4].mxu0 %vm464_vm1, %v452_v8  ;;  %s2099_s22 = sshll.u32 %s401_s19, 3  ;;  %v913_v8 = vand.u32 15, %v2550_v25  ;;  %v990_v24 = vand.u32 15, %v900_v6  ;;  %v1004_v29 = vand.u32 15, %v902_v10  ;;  %v2661_v35 = vsel %vm2633_vm8, 1.0, %v2376_v58  ;;  %s3324_s19 = scalar_lea.vmem %s3380_s7, %s2103_s21 }
  0x24   : > { %2232 = vmatprep.mubr.msk.f32.mxu0 %vm464_vm1, %v453_v9  ;;  %s403_s10 = scalar_lea.vmem %s3373_s0, %s2099_s22  ;;  %v901_v9 = vadd.s32 96, %v2550_v25  ;;  %v2666_v36 = vsel %vm2647_vm11, 1.0, %v2376_v58  ;;  %v2676_v42 = vsel %vm2639_vm9, 1.0, %v2376_v58  ;;  %v2681_v43 = vsel %vm2643_vm10, 1.0, %v2376_v58 }
  0x25   : > { %v2332_v21 = vld [vmem:[%s403_s10] sm:%s2331_s23]  ;;  %v2335_v22 = vld [vmem:[%s403_s10 + $0x8] sm:%s2331_s23]  ;;  %vm2651_vm12 = vcmp.ne.s32.totalorder %v913_v8, 0  ;;  %vm2683_vm15 = vcmp.ne.s32.totalorder %v990_v24, 15  ;;  %vm2694_vm2 = vcmp.ne.s32.totalorder %v1004_v29, 15 }
  0x26   : > { %v997_v28 = vand.u32 15, %v901_v9  ;;  %v2671_v41 = vsel %vm2651_vm12, 1.0, %v2376_v58  ;;  %v2722_v6 = vsel %vm2683_vm15, 1.0, %v2376_v58 }
  0x27   : > { %2233 = vmatmul.mubr.msk.f32.gmra.mrb[6].mxu0 %vm464_vm1, %v454_v11  ;;  %v903_v11 = vadd.s32 112, %v2550_v25  ;;  %3415 = vst [vmem:[#allocation3_spill] sm:$0xff] %v2722_v6 }
  0x28   : > { %2235 = vmatprep.mubr.msk.f32.mxu0 %vm464_vm1, %v455_v13  ;;  %v983_v13 = vand.u32 15, %v899_v62  ;;  %vm2690_vm0 = vcmp.ne.s32.totalorder %v997_v28, 0 }
  0x29   : > { %v1011_v30 = vand.u32 15, %v903_v11 }
  0x2a   : > { %vm1159_vm14 = vcmp.ne.s32.totalorder %v983_v13, 0  ;;  %v2742_v13 = vsel %vm2694_vm2, 1.0, %v2376_v58 }
  0x2b   : > { %2236 = vmatmul.mubr.msk.f32.gmra.mrb[8].mxu0 %vm464_vm1, %v456_v14  ;;  %v904_v14 = vadd.s32 120, %v2550_v25  ;;  %v2688_v48 = vsel %vm1159_vm14, 1.0, %v2376_v58  ;;  %vm2698_vm3 = vcmp.ne.s32.totalorder %v1011_v30, 0  ;;  %3421 = vst [vmem:[#allocation5_spill] sm:$0xff] %v2742_v13 }
  0x2c   : > { %2238 = vmatprep.mubr.msk.f32.mxu0 %vm464_vm1, %v457_v15  ;;  %v905_v15 = vadd.s32 128, %v2550_v25 }
  0x2d   : > { %v1018_v32 = vand.u32 15, %v904_v14 }
  0x2e   : > { %v1025_v33 = vand.u32 15, %v905_v15 }
  0x2f   : > { %2239 = vmatmul.mubr.msk.f32.gmra.mrb[10].mxu0 %vm464_vm1, %v458_v16  ;;  %v906_v16 = vadd.s32 136, %v2550_v25  ;;  %vm2705_vm4 = vcmp.ne.s32.totalorder %v1018_v32, 15 }
  0x30   : > { %2241 = vmatprep.mubr.msk.f32.mxu0 %vm464_vm1, %v459_v17  ;;  %v2631_v17 = vsel %vm2613_vm6, 1.0, %v2376_v58  ;;  %vm2709_vm5 = vcmp.ne.s32.totalorder %v1025_v33, 0 }
  0x31   : > { %v1032_v34 = vand.u32 15, %v906_v16  ;;  %v2750_v16 = vsel %vm2698_vm3, 1.0, %v2376_v58 }
  0x32   : > { %3422 = vst [vmem:[#allocation6_spill] sm:$0xff] %v2750_v16 }
  0x33   : > { %2242 = vmatmul.mubr.msk.f32.gmra.mrb[12].mxu0 %vm464_vm1, %v460_v18  ;;  %vm2713_vm6 = vcmp.ne.s32.totalorder %v1032_v34, 15  ;;  %v2755_v18 = vsel %vm2705_vm4, 1.0, %v2376_v58 }
  0x34   : > { %2244 = vmatprep.mubr.msk.f32.mxu0 %vm464_vm1, %v461_v19  ;;  %v907_v19 = vadd.s32 144, %v2550_v25  ;;  %3423 = vst [vmem:[#allocation7_spill] sm:$0xff] %v2755_v18 }
  0x36   : > { %v1039_v37 = vand.u32 15, %v907_v19  ;;  %v2760_v19 = vsel %vm2709_vm5, 1.0, %v2376_v58 }
  0x37   : > { %2245 = vmatmul.mubr.msk.f32.gmra.mrb[14].mxu0 %vm464_vm1, %v462_v20  ;;  %v908_v20 = vadd.s32 152, %v2550_v25  ;;  %3424 = vst [vmem:[#allocation8_spill] sm:$0xff] %v2760_v19 }
  0x38   : > { %2249 = vmatprep.mubr.msk.f32.mxu0 %vm464_vm1, %v2332_v21  ;;  %vm2724_vm8 = vcmp.ne.s32.totalorder %v1039_v37, 0 }
  0x39   : > { %v1046_v40 = vand.u32 15, %v908_v20  ;;  %v2765_v20 = vsel %vm2713_vm6, 1.0, %v2376_v58 }
  0x3a   : > { %3425 = vst [vmem:[#allocation9_spill] sm:$0xff] %v2765_v20 }
  0x3b   : > { %2250 = vmatmul.mubr.msk.f32.vlgmr.msra.gmra.mrb[16].mxu0 %vm464_vm1, %v2335_v22  ;;  %vm2728_vm9 = vcmp.ne.s32.totalorder %v1046_v40, 15 }
  0x3c   : > { %v2781_v27 = vsel %vm2728_vm9, 1.0, %v2376_v58 }
  0x3d   : > { %3427 = vst [vmem:[#allocation11_spill] sm:$0xff] %v2781_v27 }
  0xee   : > { %v2225_v7 = vpop.f32.mrb[0].mxu0 }
  0xef   : > { %663 = vst.msk [vmem:[#allocation2 + $0x18] sm:$0xff] %vm464_vm1, %v2225_v7  ;;  %v583_v12 = vpop.f32.mrb[1].mxu0 }
  0xf0   : > { %662 = vst.msk [vmem:[#allocation2 + $0x10] sm:$0xff] %vm464_vm1, %v583_v12  ;;  %v2737_v12 = vsel %vm2690_vm0, 1.0, %v2376_v58 }
  0xf1   : > { %3420 = vst [vmem:[#allocation4_spill] sm:$0xff] %v2737_v12 }
  0xf2   : > { %v2228_v26 = vpop.f32.mrb[2].mxu0 }
  0xf3   : > { %665 = vst.msk [vmem:[#allocation2 + $0x28] sm:$0xff] %vm464_vm1, %v2228_v26  ;;  %v593_v31 = vpop.f32.mrb[3].mxu0  ;;  %v2776_v26 = vsel %vm2724_vm8, 1.0, %v2376_v58 }
  0xf4   : > { %664 = vst.msk [vmem:[#allocation2 + $0x20] sm:$0xff] %vm464_vm1, %v593_v31  ;;  %v2256_v4 = vpop.f32.mrb[0].mxu1  ;;  %3426 = vst [vmem:[#allocation10_spill] sm:$0xff] %v2776_v26 }
  0xf5   : > { %867 = vst.msk [vmem:[#allocation2 + $0x98] sm:$0xff] %vm464_vm1, %v2256_v4  ;;  %v857_v9 = vpop.f32.mrb[1].mxu1 }
  0xf6   : > { %v2231_v45 = vpop.f32.mrb[4].mxu0  ;;  %v871_v47 = vld [vmem:[#allocation2 + $0x18] sm:$0xff]  ;;  %866 = vst.msk [vmem:[#allocation2 + $0x90] sm:$0xff] %vm464_vm1, %v857_v9 }
  0xf7   : > { %667 = vst.msk [vmem:[#allocation2 + $0x38] sm:$0xff] %vm464_vm1, %v2231_v45  ;;  %v603_v52 = vpop.f32.mrb[5].mxu0  ;;  %v2703_v53 = vld [vmem:[#allocation2 + $0x10] sm:$0xff]  ;;  %v1333_v62 = vrot.slane %v871_v47, 1  ;;  %v1272_v11 = vrot.slane %v871_v47, 7  ;;  %v2786_v31 = vmul.f32 %v2565_v39, %v871_v47  ;;  %v1436_v34 = vmul.f32 %v2563_v38, %v871_v47 }
  0xf8   : > { %666 = vst.msk [vmem:[#allocation2 + $0x30] sm:$0xff] %vm464_vm1, %v603_v52  ;;  %v3381_v5 = vrot.slane %v2703_v53, 1  ;;  %v3382_v10 = vrot.slane %v2703_v53, 7  ;;  %v2790_v32 = vmul.f32 %v2565_v39, %v2703_v53  ;;  %v2798_v58 = vmul.f32 %v2563_v38, %v2703_v53 }
  0xfa   : > { %v2234_v14 = vpop.f32.mrb[6].mxu0  ;;  %v2745_v15 = vld [vmem:[#allocation2 + $0x28] sm:$0xff]  ;;  %v1367_v24 = vsel %vm1350_vm7, %v3381_v5, %v1333_v62  ;;  %v1306_v33 = vsel %vm1289_vm13, %v3382_v10, %v1272_v11 }
  0xfb   : > { %669 = vst.msk [vmem:[#allocation2 + $0x48] sm:$0xff] %vm464_vm1, %v2234_v14  ;;  %v613_v21 = vpop.f32.mrb[7].mxu0  ;;  %v872_v22 = vld [vmem:[#allocation2 + $0x20] sm:$0xff]  ;;  %v1335_v23 = vrot.slane %v2745_v15, 1  ;;  %v1274_v30 = vrot.slane %v2745_v15, 7  ;;  %v2806_v45 = vmul.f32 %v2586_v54, %v1367_v24  ;;  %v2809_v49 = vmul.f32 %v2590_v56, %v1367_v24 }
  0xfc   : > { %668 = vst.msk [vmem:[#allocation2 + $0x40] sm:$0xff] %vm464_vm1, %v613_v21  ;;  %v1273_v28 = vrot.slane %v872_v22, 7  ;;  %v1334_v29 = vrot.slane %v872_v22, 1  ;;  %v1437_v52 = vmul.f32 %v2563_v38, %v872_v22  ;;  %v2817_v1 = vmul.f32 %v2592_v57, %v872_v22 }
  0xfd   : > { %v2833_v7 = vmul.f32 %v2588_v55, %v1306_v33  ;;  %v2837_v8 = vmul.f32 %v2592_v57, %v2745_v15  ;;  %v2842_v14 = vmul.f32 %v2565_v39, %v872_v22  ;;  %v1400_v21 = vmul.f32 %v2575_v46, %v1306_v33 }
  0xfe   : > { %v2237_v37 = vpop.f32.mrb[8].mxu0  ;;  %v1305_v40 = vsel %vm1289_vm13, %v1272_v11, %v1273_v28  ;;  %v1366_v44 = vsel %vm1350_vm7, %v1333_v62, %v1334_v29  ;;  %v1365_v47 = vsel %vm1350_vm7, %v1334_v29, %v1335_v23  ;;  %3428 = vst [vmem:[#allocation12_spill] sm:$0xff] %v2817_v1  ;;  %v2821_v2 = vld [vmem:[#allocation2 + $0x38] sm:$0xff] }
  0xff   : > { %671 = vst.msk [vmem:[#allocation2 + $0x58] sm:$0xff] %vm464_vm1, %v2237_v37  ;;  %v623_v50 = vpop.f32.mrb[9].mxu0  ;;  %v1314_v51 = vmul.f32 %v2597_v59, %v1305_v40  ;;  %v2819_v62 = vld [vmem:[#allocation2 + $0x30] sm:$0xff]  ;;  %v1304_v59 = vsel %vm1289_vm13, %v1273_v28, %v1274_v30  ;;  %3429 = vst [vmem:[#allocation13_spill] sm:$0xff] %v2837_v8  ;;  %v1374_v9 = vmul.f32 %v2600_v60, %v1366_v44  ;;  %v2845_v28 = vld [vmem:[#allocation2 + $0x98] sm:$0xff]  ;;  %v1276_v27 = vrot.slane %v2821_v2, 7 }
 0x100   : > { %670 = vst.msk [vmem:[#allocation2 + $0x50] sm:$0xff] %vm464_vm1, %v623_v50  ;;  %v1336_v4 = vrot.slane %v2819_v62, 1  ;;  %v1473_v29 = vmul.f32 %v2586_v54, %v1365_v47  ;;  %v1275_v40 = vrot.slane %v2819_v62, 7  ;;  %v1337_v50 = vrot.slane %v2821_v2, 1 }
 0x101   : > { %v1401_v11 = vmul.f32 %v2575_v46, %v1314_v51  ;;  %v2854_v22 = vmul.f32 %v2590_v56, %v1365_v47  ;;  %v2857_v33 = vmul.f32 %v2827_v3, %v1365_v47  ;;  %v2860_v44 = vmul.f32 %v2575_v46, %v1304_v59 }
 0x102   : > { %v2240_v24 = vpop.f32.mrb[10].mxu0  ;;  %v1364_v37 = vsel %vm1350_vm7, %v1335_v23, %v1336_v4  ;;  %v2863_v5 = vmul.f32 %v2602_v61, %v1304_v59  ;;  %v2874_v20 = vmul.f32 %v2602_v61, %v1314_v51  ;;  %v1664_v25 = vmul.f32 %v2592_v57, %v2845_v28 }
 0x103   : > { %673 = vst.msk [vmem:[#allocation2 + $0x68] sm:$0xff] %vm464_vm1, %v2240_v24  ;;  %v633_v60 = vpop.f32.mrb[11].mxu0  ;;  %3430 = vst [vmem:[#allocation14_spill] sm:$0xff] %v2857_v33  ;;  %v2865_v23 = vld [vmem:[#allocation2 + $0x40] sm:$0xff]  ;;  %v1453_v10 = vadd.f32 %v1437_v52, %v1401_v11  ;;  %v1303_v24 = vsel %vm1289_vm13, %v1274_v30, %v1275_v40  ;;  %v2877_v19 = vmul.f32 %v2608_v63, %v1364_v37 }
 0x104   : > { %3431 = vst [vmem:[#allocation15_spill] sm:$0xff] %v2863_v5  ;;  %672 = vst.msk [vmem:[#allocation2 + $0x60] sm:$0xff] %vm464_vm1, %v633_v60  ;;  %v3383_v26 = vrot.slane %v2865_v23, 1  ;;  %v1316_v18 = vmul.f32 %v2611_v0, %v1303_v24  ;;  %v2881_v52 = vmul.f32 %v2590_v56, %v1374_v9  ;;  %v1363_v30 = vsel %vm1350_vm7, %v1336_v4, %v1337_v50 }
 0x105   : > { %3432 = vst [vmem:[#allocation16_spill] sm:$0xff] %v2874_v20  ;;  %v1439_v11 = vmul.f32 %v2563_v38, %v2819_v62  ;;  %v2894_v37 = vmul.f32 %v2588_v55, %v1314_v51  ;;  %v1302_v24 = vsel %vm1289_vm13, %v1275_v40, %v1276_v27  ;;  %v1489_v47 = vadd.f32 %v1473_v29, %v1453_v10 }
 0x106   : > { %v2243_v16 = vpop.f32.mrb[12].mxu0  ;;  %v1362_v60 = vsel %vm1350_vm7, %v1337_v50, %v3383_v26  ;;  %v1403_v0 = vmul.f32 %v2575_v46, %v1316_v18  ;;  %v2904_v50 = vmul.f32 %v2592_v57, %v2819_v62  ;;  %v1472_v26 = vmul.f32 %v2586_v54, %v1374_v9 }
 0x107   : > { %675 = vst.msk [vmem:[#allocation2 + $0x78] sm:$0xff] %vm464_vm1, %v2243_v16  ;;  %v643_v63 = vpop.f32.mrb[13].mxu0  ;;  %v2899_v4 = vmul.f32 %v2631_v17, %v1362_v60  ;;  %v1452_v16 = vadd.f32 %v1436_v34, %v1400_v21  ;;  %v2909_v51 = vmul.f32 %v2827_v3, %v2877_v19  ;;  %v1475_v13 = vmul.f32 %v2586_v54, %v1363_v30  ;;  %v2921_v21 = vld [vmem:[#allocation2 + $0x48] sm:$0xff] }
 0x108   : > { %674 = vst.msk [vmem:[#allocation2 + $0x70] sm:$0xff] %vm464_vm1, %v643_v63  ;;  %3433 = vst [vmem:[#allocation17_spill] sm:$0xff] %v2904_v50  ;;  %v1581_v40 = vmul.f32 %v2590_v56, %v1363_v30  ;;  %v2914_v17 = vmul.f32 %v2827_v3, %v1363_v30  ;;  %v2917_v10 = vmul.f32 %v2602_v61, %v1316_v18  ;;  %v1339_v33 = vrot.slane %v2921_v21, 1 }
 0x109   : > { %3434 = vst [vmem:[#allocation18_spill] sm:$0xff] %v2909_v51  ;;  %v1404_v29 = vmul.f32 %v2575_v46, %v1302_v24  ;;  %v1488_v34 = vadd.f32 %v1472_v26, %v1452_v16  ;;  %v1508_v9 = vmul.f32 %v2588_v55, %v1304_v59  ;;  %v1455_v12 = vadd.f32 %v1439_v11, %v1403_v0 }
 0x10a   : > { %3435 = vst [vmem:[#allocation19_spill] sm:$0xff] %v2914_v17  ;;  %v2246_v60 = vpop.f32.mrb[14].mxu0  ;;  %3436 = vst [vmem:[#allocation20_spill] sm:$0xff] %v2917_v10  ;;  %v1440_v51 = vmul.f32 %v2563_v38, %v2821_v2  ;;  %v2928_v30 = vmul.f32 %v2586_v54, %v2899_v4  ;;  %v1277_v17 = vrot.slane %v2865_v23, 7  ;;  %v1510_v26 = vmul.f32 %v2588_v55, %v1302_v24 }
 0x10b   : > { %677 = vst.msk [vmem:[#allocation2 + $0x88] sm:$0xff] %vm464_vm1, %v2246_v60  ;;  %v653_v63 = vpop.f32.mrb[15].mxu0  ;;  %v1524_v59 = vadd.f32 %v1508_v9, %v1488_v34  ;;  %v1544_v16 = vmul.f32 %v2565_v39, %v2745_v15  ;;  %v1509_v60 = vmul.f32 %v2588_v55, %v1316_v18  ;;  %v1580_v11 = vmul.f32 %v2590_v56, %v2877_v19  ;;  %v2947_v18 = vld [vmem:[#allocation2 + $0x50] sm:$0xff] }
 0x10c   : > { %3437 = vst [vmem:[#allocation21_spill] sm:$0xff] %v2928_v30  ;;  %676 = vst.msk [vmem:[#allocation2 + $0x80] sm:$0xff] %vm464_vm1, %v653_v63  ;;  %v1301_v0 = vsel %vm1289_vm13, %v1276_v27, %v1277_v17  ;;  %v1545_v9 = vmul.f32 %v2565_v39, %v2819_v62  ;;  %v2950_v30 = vadd.f32 %v1475_v13, %v1455_v12  ;;  %v3440_v13 = vrot.slane %v2865_v23, 1 }
 0x10d   : > { %v1560_v63 = vadd.f32 %v1544_v16, %v1524_v59  ;;  %v2943_v1 = vmul.f32 %v2661_v35, %v1301_v0  ;;  %v1525_v34 = vadd.f32 %v1509_v60, %v1489_v47  ;;  %v2952_v27 = vadd.f32 %v1440_v51, %v1404_v29 }
 0x10e   : > { %v2251_v50 = vpop.f32.mrb[16].mxu0  ;;  %v1616_v6 = vmul.f32 %v2602_v61, %v1302_v24  ;;  %v3439_v59 = vrot.slane %v2921_v21, 7  ;;  %v1361_v24 = vsel %vm1350_vm7, %v3440_v13, %v1339_v33  ;;  %v1340_v51 = vrot.slane %v2947_v18, 1 }
 0x10f   : > { %780 = vst.msk [vmem:[#allocation2 + $0x8] sm:$0xff] %vm464_vm1, %v2251_v50  ;;  %v770_v8 = vpop.f32.mrb[17].mxu0  ;;  %3438 = vst [vmem:[#allocation22_spill] sm:$0xff] %v2952_v27  ;;  %v1596_v47 = vadd.f32 %v1580_v11, %v1560_v63  ;;  %v1405_v62 = vmul.f32 %v2575_v46, %v2943_v1  ;;  %v1441_v50 = vmul.f32 %v2563_v38, %v2865_v23 }
 0x110   : > { %v1300_v35 = vsel %vm1289_vm13, %v1277_v17, %v3439_v59  ;;  %779 = vst.msk [vmem:[#allocation2] sm:$0xff] %vm464_vm1, %v770_v8  ;;  %v1561_v12 = vadd.f32 %v1545_v9, %v1525_v34  ;;  %v1438_v8 = vmul.f32 %v2563_v38, %v2745_v15  ;;  %v1474_v11 = vmul.f32 %v2586_v54, %v2877_v19 }
 0x111   : > { %v1406_v29 = vmul.f32 %v2575_v46, %v1300_v35  ;;  %v1632_v17 = vadd.f32 %v1616_v6, %v1596_v47  ;;  %v1457_v16 = vadd.f32 %v1441_v50, %v1405_v62  ;;  %v1652_v0 = vmul.f32 %v2592_v57, %v2821_v2 }
 0x112   : > { %v1597_v60 = vadd.f32 %v1581_v40, %v1561_v12  ;;  %v1688_v63 = vmul.f32 %v2827_v3, %v2899_v4  ;;  %v1442_v34 = vmul.f32 %v2563_v38, %v2921_v21  ;;  %v1454_v9 = vadd.f32 %v1438_v8, %v2860_v44 }
 0x113   : > { %v1477_v59 = vmul.f32 %v2586_v54, %v1361_v24  ;;  %v2983_v6 = vmul.f32 %v2590_v56, %v1361_v24  ;;  %v1617_v15 = vmul.f32 %v2602_v61, %v2943_v1  ;;  %v1653_v19 = vmul.f32 %v2592_v57, %v2865_v23 }
 0x114   : > { %v2990_v40 = vmul.f32 %v2827_v3, %v1361_v24  ;;  %v1360_v47 = vsel %vm1350_vm7, %v1339_v33, %v1340_v51  ;;  %v2996_v44 = vadd.f32 %v1442_v34, %v1406_v29  ;;  %v1490_v62 = vadd.f32 %v1474_v11, %v1454_v9 }
 0x115   : > { %v1668_v12 = vadd.f32 %v1652_v0, %v1632_v17  ;;  %v2998_v13 = vadd.f32 %v1477_v59, %v1457_v16  ;;  %v1633_v8 = vadd.f32 %v1617_v15, %v1597_v60  ;;  %v3001_v27 = vmul.f32 %v2588_v55, %v1300_v35 }
 0x116   : > { %3441 = vst [vmem:[#allocation23_spill] sm:$0xff] %v2990_v40  ;;  %v869_v50 = vld [vmem:[#allocation2 + $0x8] sm:$0xff]  ;;  %v1526_v5 = vadd.f32 %v1510_v26, %v1490_v62  ;;  %v1546_v40 = vmul.f32 %v2565_v39, %v2821_v2  ;;  %v3010_v17 = vmul.f32 %v2666_v36, %v1360_v47  ;;  %v1582_v16 = vmul.f32 %v2590_v56, %v2899_v4 }
 0x117   : > { %v3003_v20 = vld [vmem:[#allocation2] sm:$0xff]  ;;  %v1270_v24 = vrot.slane %v869_v50, 7  ;;  %v1331_v10 = vrot.slane %v869_v50, 1  ;;  %v3442_v60 = vrot.slane %v2703_v53, 7  ;;  %v3443_v26 = vrot.slane %v2703_v53, 1 }
 0x118   : > { %v1269_v33 = vrot.slane %v3003_v20, 7  ;;  %v1330_v29 = vrot.slane %v3003_v20, 1  ;;  %v1562_v0 = vadd.f32 %v1546_v40, %v1526_v5  ;;  %v1618_v34 = vmul.f32 %v2602_v61, %v1300_v35 }
 0x119   : > { %v1307_v11 = vsel %vm1289_vm13, %v1270_v24, %v3442_v60  ;;  %v1368_v2 = vsel %vm1350_vm7, %v1331_v10, %v3443_v26  ;;  %v3444_v9 = vrot.slane %v2845_v28, 7  ;;  %v3029_v15 = vadd.f32 %v1688_v63, %v1668_v12 }
 0x11a   : > { %v1312_v4 = vmul.f32 %v2676_v42, %v1307_v11  ;;  %v1372_v59 = vmul.f32 %v2681_v43, %v1368_v2  ;;  %v1308_v53 = vsel %vm1289_vm13, %v1269_v33, %v1270_v24  ;;  %v1434_v5 = vmul.f32 %v2563_v38, %v869_v50  ;;  %v3045_v24 = vld [vmem:[#allocation2 + $0x58] sm:$0xff] }
 0x11b   : > { %v1309_v36 = vsel %vm1289_vm13, %v3444_v9, %v1269_v33  ;;  %v1598_v40 = vadd.f32 %v1582_v16, %v1562_v0  ;;  %v1369_v35 = vsel %vm1350_vm7, %v1330_v29, %v1331_v10  ;;  %v1398_v62 = vmul.f32 %v2575_v46, %v1308_v53 }
 0x11c   : > { %v1310_v47 = vmul.f32 %v2671_v41, %v1309_v36  ;;  %v1470_v42 = vmul.f32 %v2586_v54, %v1372_v59  ;;  %v1399_v43 = vmul.f32 %v2575_v46, %v1312_v4  ;;  %v1433_v41 = vmul.f32 %v2563_v38, %v3003_v20 }
 0x11d   : > { %v1669_v12 = vadd.f32 %v1653_v19, %v1633_v8  ;;  %v1279_v50 = vrot.slane %v2947_v18, 7  ;;  %v1450_v33 = vadd.f32 %v1434_v5, %v1398_v62  ;;  %v1654_v10 = vmul.f32 %v2592_v57, %v2921_v21 }
 0x11e   : > { %v1397_v63 = vmul.f32 %v2575_v46, %v1310_v47  ;;  %v1451_v16 = vadd.f32 %v2798_v58, %v1399_v43  ;;  %v1511_v60 = vmul.f32 %v2588_v55, %v2943_v1  ;;  %v1469_v26 = vmul.f32 %v2586_v54, %v1369_v35 }
 0x11f   : > { %v1634_v2 = vadd.f32 %v1618_v34, %v1598_v40  ;;  %v3445_v0 = vrot.slane %v2921_v21, 7  ;;  %v1486_v8 = vadd.f32 %v1470_v42, %v1450_v33  ;;  %v1341_v36 = vrot.slane %v3045_v24, 1 }
 0x120   : > { %v1449_v11 = vadd.f32 %v1433_v41, %v1397_v63  ;;  %v1487_v9 = vadd.f32 %v2806_v45, %v1451_v16  ;;  %v1505_v47 = vmul.f32 %v2588_v55, %v1312_v4  ;;  %v1527_v1 = vadd.f32 %v1511_v60, %v2950_v30  ;;  %v3072_v45 = vld [vmem:[#allocation2 + $0x60] sm:$0xff] }
 0x121   : > { %v1299_v19 = vsel %vm1289_vm13, %v3445_v0, %v1279_v50  ;;  %v1547_v34 = vmul.f32 %v2565_v39, %v2865_v23  ;;  %v1522_v53 = vadd.f32 %v2833_v7, %v1486_v8  ;;  %v3069_v40 = vmul.f32 %v2586_v54, %v3010_v17  ;;  %v3446_v60 = vld [vmem:[#allocation23_spill] sm:$0xff]  ;;  %v3448_v0 = vld [vmem:[#allocation20_spill] sm:$0xff] }
 0x122   : > { %v1320_v58 = vmul.f32 %v2688_v48, %v1299_v19  ;;  %v1485_v59 = vadd.f32 %v1469_v26, %v1449_v11  ;;  %v1523_v5 = vadd.f32 %v2894_v37, %v1487_v9  ;;  %v1670_v62 = vadd.f32 %v1654_v10, %v1634_v2  ;;  %v3449_v9 = vld [vmem:[#allocation16_spill] sm:$0xff] }
 0x123   : > { %v1690_v30 = vmul.f32 %v2827_v3, %v3010_v17  ;;  %v1563_v4 = vadd.f32 %v1547_v34, %v1527_v1  ;;  %v1558_v23 = vadd.f32 %v2786_v31, %v1522_v53  ;;  %v1359_v37 = vsel %vm1350_vm7, %v1340_v51, %v1341_v36  ;;  %v3452_v34 = vld [vmem:[#allocation13_spill] sm:$0xff] }
 0x124   : > { %v1407_v48 = vmul.f32 %v2575_v46, %v1320_v58  ;;  %v1521_v35 = vadd.f32 %v1505_v47, %v1485_v59  ;;  %v1559_v7 = vadd.f32 %v2842_v14, %v1523_v5  ;;  %v1443_v42 = vmul.f32 %v2563_v38, %v2947_v18  ;;  %v3451_v47 = vld [vmem:[#allocation21_spill] sm:$0xff] }
 0x125   : > { %v1599_v63 = vadd.f32 %v2983_v6, %v1563_v4  ;;  %v1280_v41 = vrot.slane %v3045_v24, 7  ;;  %v1342_v33 = vrot.slane %v3072_v45, 1  ;;  %v1594_v31 = vadd.f32 %v2881_v52, %v1558_v23  ;;  %v3447_v6 = vld [vmem:[#allocation15_spill] sm:$0xff]  ;;  %v3454_v4 = vld [vmem:[#allocation17_spill] sm:$0xff] }
 0x126   : > { %v1557_v43 = vadd.f32 %v2790_v32, %v1521_v35  ;;  %v1595_v14 = vadd.f32 %v2854_v22, %v1559_v7  ;;  %v1459_v16 = vadd.f32 %v1443_v42, %v1407_v48  ;;  %v1619_v10 = vmul.f32 %v2602_v61, %v1320_v58  ;;  %v3117_v7 = vld [vmem:[#allocation2 + $0x68] sm:$0xff] }
 0x127   : > { %v1705_v11 = vadd.f32 %v3446_v60, %v1669_v12  ;;  %v3093_v26 = vadd.f32 %v1690_v30, %v1670_v62  ;;  %v1479_v32 = vmul.f32 %v2586_v54, %v1359_v37  ;;  %v1630_v2 = vadd.f32 %v3447_v6, %v1594_v31  ;;  %v3450_v12 = vld [vmem:[#allocation22_spill] sm:$0xff]  ;;  %v3453_v62 = vld [vmem:[#allocation12_spill] sm:$0xff]  ;;  %v3127_v60 = vld [vmem:[#allocation2 + $0x70] sm:$0xff] }
 0x128   : > { %v1593_v51 = vadd.f32 %v2809_v49, %v1557_v43  ;;  %v1631_v19 = vadd.f32 %v3448_v0, %v1595_v14  ;;  %v1585_v8 = vmul.f32 %v2590_v56, %v1359_v37  ;;  %v1635_v52 = vadd.f32 %v1619_v10, %v1599_v63  ;;  %v3455_v43 = vld [vmem:[#allocation3_spill] sm:$0xff] }
 0x129   : > { %v1298_v59 = vsel %vm1289_vm13, %v1279_v50, %v1280_v41  ;;  %v1358_v49 = vsel %vm1350_vm7, %v1341_v36, %v1342_v33  ;;  %v1492_v1 = vadd.f32 %v3451_v47, %v3450_v12  ;;  %v1666_v53 = vadd.f32 %v3452_v34, %v1630_v2 }
 0x12a   : > { %v1629_v22 = vadd.f32 %v3449_v9, %v1593_v51  ;;  %v3107_v5 = vadd.f32 %v1479_v32, %v1459_v16  ;;  %v1655_v48 = vmul.f32 %v2592_v57, %v2947_v18  ;;  %v1691_v35 = vmul.f32 %v2827_v3, %v1359_v37  ;;  %v3456_v37 = vld [vmem:[#allocation14_spill] sm:$0xff] }
 0x12b   : > { %v1667_v23 = vadd.f32 %v3454_v4, %v1631_v19  ;;  %v1528_v50 = vadd.f32 %v3001_v27, %v1492_v1  ;;  %v1548_v36 = vmul.f32 %v2565_v39, %v2921_v21  ;;  %v1382_v63 = vmul.f32 %v3455_v43, %v1358_v49  ;;  %v3457_v21 = vld [vmem:[#allocation18_spill] sm:$0xff]  ;;  %v3458_v19 = vld [vmem:[#allocation19_spill] sm:$0xff] }
 0x12c   : > { %v1665_v30 = vadd.f32 %v3453_v62, %v1629_v22  ;;  %v1671_v42 = vadd.f32 %v1655_v48, %v1635_v52  ;;  %v1408_v31 = vmul.f32 %v2575_v46, %v1298_v59  ;;  %v1444_v14 = vmul.f32 %v2563_v38, %v3045_v24 }
 0x12d   : > { %v1514_v10 = vmul.f32 %v2588_v55, %v1298_v59  ;;  %v1564_v51 = vadd.f32 %v1548_v36, %v1528_v50  ;;  %v1584_v27 = vmul.f32 %v2590_v56, %v3010_v17  ;;  %v1702_v32 = vadd.f32 %v3457_v21, %v1666_v53 }
 0x12e   : > { %v1701_v16 = vadd.f32 %v3456_v37, %v1665_v30  ;;  %v1281_v6 = vrot.slane %v3072_v45, 7  ;;  %v1343_v2 = vrot.slane %v3117_v7, 1  ;;  %v1513_v0 = vmul.f32 %v2588_v55, %v1320_v58  ;;  %v3460_v37 = vld [vmem:[#allocation5_spill] sm:$0xff] }
 0x12f   : > { %v1703_v52 = vadd.f32 %v3458_v19, %v1667_v23  ;;  %v1600_v9 = vadd.f32 %v1584_v27, %v1564_v51  ;;  %v1620_v22 = vmul.f32 %v2602_v61, %v1298_v59  ;;  %v1549_v17 = vmul.f32 %v2565_v39, %v2947_v18  ;;  %v3459_v18 = vld [vmem:[#allocation4_spill] sm:$0xff] }
 0x130   : > { %2259 = vmatprep.mubr.msk.f32.mxu1 %vm464_vm1, %v1701_v16  ;;  %v1297_v49 = vsel %vm1289_vm13, %v1280_v41, %v1281_v6  ;;  %v1529_v12 = vadd.f32 %v1513_v0, %v2998_v13  ;;  %v1282_v47 = vrot.slane %v3117_v7, 7  ;;  %v1344_v58 = vrot.slane %v3127_v60, 1 }
 0x131   : > { %2260 = vmatmul.mubr.msk.f32.vlgmr.msra.gmra.mrb[2].mxu1 %vm464_vm1, %v1702_v32  ;;  %v3145_v1 = vadd.f32 %v1444_v14, %v1408_v31  ;;  %v1636_v34 = vadd.f32 %v1620_v22, %v1600_v9  ;;  %v1656_v59 = vmul.f32 %v2592_v57, %v3045_v24  ;;  %v1322_v53 = vmul.f32 %v3459_v18, %v1297_v49  ;;  %v3202_v18 = vld [vmem:[#allocation2 + $0x80] sm:$0xff] }
 0x132   : > { %2262 = vmatprep.mubr.msk.f32.mxu1 %vm464_vm1, %v1703_v52  ;;  %v3151_v48 = vmul.f32 %v2586_v54, %v1382_v63  ;;  %v1357_v13 = vsel %vm1350_vm7, %v1342_v33, %v1343_v2  ;;  %v1565_v41 = vadd.f32 %v1549_v17, %v1529_v12  ;;  %v1356_v62 = vsel %vm1350_vm7, %v1343_v2, %v1344_v58  ;;  %v3461_v12 = vld [vmem:[#allocation6_spill] sm:$0xff] }
 0x133   : > { %v1707_v30 = vadd.f32 %v1691_v35, %v1671_v42  ;;  %v1672_v4 = vadd.f32 %v1656_v59, %v1636_v34  ;;  %v1692_v23 = vmul.f32 %v2827_v3, %v1382_v63  ;;  %v1445_v50 = vmul.f32 %v2563_v38, %v3072_v45 }
 0x134   : > { %v1601_v36 = vadd.f32 %v1585_v8, %v1565_v41  ;;  %v1621_v43 = vmul.f32 %v2602_v61, %v1322_v53  ;;  %v1296_v33 = vsel %vm1289_vm13, %v1281_v6, %v1282_v47  ;;  %v1494_v31 = vadd.f32 %v3069_v40, %v2996_v44  ;;  %v3178_v44 = vld [vmem:[#allocation2 + $0x78] sm:$0xff] }
 0x135   : > { %2263 = vmatmul.mubr.msk.f32.gmra.mrb[4].mxu1 %vm464_vm1, %v3029_v15  ;;  %v1409_v35 = vmul.f32 %v2575_v46, %v1322_v53  ;;  %v1481_v42 = vmul.f32 %v2586_v54, %v1357_v13  ;;  %v1657_v14 = vmul.f32 %v2592_v57, %v3072_v45  ;;  %v3173_v15 = vmul.f32 %v3460_v37, %v1356_v62 }
 0x136   : > { %2265 = vmatprep.mubr.msk.f32.mxu1 %vm464_vm1, %v1705_v11  ;;  %v1587_v8 = vmul.f32 %v2590_v56, %v1357_v13  ;;  %v1637_v16 = vadd.f32 %v1621_v43, %v1601_v36  ;;  %v1530_v51 = vadd.f32 %v1514_v10, %v1494_v31  ;;  %v1550_v27 = vmul.f32 %v2565_v39, %v3045_v24 }
 0x137   : > { %v1708_v40 = vadd.f32 %v1692_v23, %v1672_v4  ;;  %v1693_v11 = vmul.f32 %v2827_v3, %v1357_v13  ;;  %v1410_v21 = vmul.f32 %v2575_v46, %v1296_v33  ;;  %v1446_v32 = vmul.f32 %v2563_v38, %v3117_v7 }
 0x138   : > { %v1673_v6 = vadd.f32 %v1657_v14, %v1637_v16  ;;  %v1566_v2 = vadd.f32 %v1550_v27, %v1530_v51  ;;  %v1586_v10 = vmul.f32 %v2590_v56, %v1382_v63  ;;  %v1283_v0 = vrot.slane %v3127_v60, 7 }
 0x139   : > { %2266 = vmatmul.mubr.msk.f32.gmra.mrb[6].mxu1 %vm464_vm1, %v3093_v26  ;;  %v1461_v24 = vadd.f32 %v1445_v50, %v1409_v35  ;;  %v3191_v19 = vmul.f32 %v2586_v54, %v3173_v15  ;;  %v1345_v52 = vrot.slane %v3178_v44, 1  ;;  %v1515_v9 = vmul.f32 %v2588_v55, %v1322_v53 }
 0x13a   : > { %2268 = vmatprep.mubr.msk.f32.mxu1 %vm464_vm1, %v1707_v30  ;;  %v1602_v22 = vadd.f32 %v1586_v10, %v1566_v2  ;;  %v1622_v26 = vmul.f32 %v2602_v61, %v1296_v33  ;;  %v1295_v17 = vsel %vm1289_vm13, %v1282_v47, %v1283_v0  ;;  %v1551_v63 = vmul.f32 %v2565_v39, %v3072_v45 }
 0x13b   : > { %v1709_v49 = vadd.f32 %v1693_v11, %v1673_v6  ;;  %v1324_v34 = vmul.f32 %v3461_v12, %v1295_v17  ;;  %v1531_v59 = vadd.f32 %v1515_v9, %v3107_v5  ;;  %v1284_v13 = vrot.slane %v3178_v44, 7  ;;  %v3231_v11 = vld [vmem:[#allocation2 + $0x88] sm:$0xff] }
 0x13c   : > { %v1462_v53 = vadd.f32 %v1446_v32, %v1410_v21  ;;  %v1516_v41 = vmul.f32 %v2588_v55, %v1296_v33  ;;  %v1638_v62 = vadd.f32 %v1622_v26, %v1602_v22  ;;  %v1658_v47 = vmul.f32 %v2592_v57, %v3117_v7 }
 0x13d   : > { %2269 = vmatmul.mubr.msk.f32.gmra.mrb[8].mxu1 %vm464_vm1, %v1708_v40  ;;  %v1497_v30 = vadd.f32 %v1481_v42, %v1461_v24  ;;  %v1694_v45 = vmul.f32 %v2827_v3, %v3173_v15  ;;  %v1355_v5 = vsel %vm1350_vm7, %v1344_v58, %v1345_v52  ;;  %v1567_v4 = vadd.f32 %v1551_v63, %v1531_v59  ;;  %v3462_v24 = vld [vmem:[#allocation7_spill] sm:$0xff]  ;;  %v3463_v63 = vld [vmem:[#allocation8_spill] sm:$0xff] }
 0x13e   : > { %2271 = vmatprep.mubr.msk.f32.mxu1 %vm464_vm1, %v1709_v49  ;;  %v1674_v23 = vadd.f32 %v1658_v47, %v1638_v62  ;;  %v1411_v50 = vmul.f32 %v2575_v46, %v1324_v34  ;;  %v1447_v36 = vmul.f32 %v2563_v38, %v3127_v60  ;;  %v1346_v43 = vrot.slane %v3202_v18, 1 }
 0x13f   : > { %v1603_v33 = vadd.f32 %v1587_v8, %v1567_v4  ;;  %v1623_v31 = vmul.f32 %v2602_v61, %v1324_v34  ;;  %v1294_v35 = vsel %vm1289_vm13, %v1283_v0, %v1284_v13  ;;  %v1496_v42 = vadd.f32 %v3151_v48, %v3145_v1 }
 0x140   : > { %v1710_v14 = vadd.f32 %v1694_v45, %v1674_v23  ;;  %v1483_v58 = vmul.f32 %v2586_v54, %v1355_v5  ;;  %v1589_v37 = vmul.f32 %v2590_v56, %v1355_v5  ;;  %v1659_v16 = vmul.f32 %v2592_v57, %v3127_v60 }
 0x141   : > { %v1639_v51 = vadd.f32 %v1623_v31, %v1603_v33  ;;  %v1354_v8 = vsel %vm1350_vm7, %v1345_v52, %v1346_v43  ;;  %v1532_v27 = vadd.f32 %v1516_v41, %v1496_v42  ;;  %v1552_v40 = vmul.f32 %v2565_v39, %v3117_v7  ;;  %v3241_v7 = vld [vmem:[#allocation2 + $0x90] sm:$0xff] }
 0x142   : > { %2272 = vmatmul.mubr.msk.f32.gmra.mrb[10].mxu1 %vm464_vm1, %v1710_v14  ;;  %v1695_v1 = vmul.f32 %v2827_v3, %v1355_v5  ;;  %v1412_v48 = vmul.f32 %v2575_v46, %v1294_v35  ;;  %v1448_v21 = vmul.f32 %v2563_v38, %v3178_v44  ;;  %v1285_v32 = vrot.slane %v3202_v18, 7 }
 0x143   : > { %v1463_v6 = vadd.f32 %v1447_v36, %v1411_v50  ;;  %v1675_v2 = vadd.f32 %v1659_v16, %v1639_v51  ;;  %v1568_v10 = vadd.f32 %v1552_v40, %v1532_v27  ;;  %v1588_v0 = vmul.f32 %v2590_v56, %v3173_v15 }
 0x144   : > { %v1386_v52 = vmul.f32 %v3462_v24, %v1354_v8  ;;  %v1293_v9 = vsel %vm1289_vm13, %v1284_v13, %v1285_v32  ;;  %v1347_v46 = vrot.slane %v3231_v11, 1  ;;  %v1517_v22 = vmul.f32 %v2588_v55, %v1324_v34 }
 0x145   : > { %v1711_v38 = vadd.f32 %v1695_v1, %v1675_v2  ;;  %v1604_v26 = vadd.f32 %v1588_v0, %v1568_v10  ;;  %v1624_v17 = vmul.f32 %v2602_v61, %v1294_v35  ;;  %v1326_v49 = vmul.f32 %v3463_v63, %v1293_v9  ;;  %v3465_v10 = vld [vmem:[#allocation10_spill] sm:$0xff] }
 0x146   : > { %v1518_v12 = vmul.f32 %v2588_v55, %v1294_v35  ;;  %v1533_v15 = vadd.f32 %v1517_v22, %v1497_v30  ;;  %v1553_v59 = vmul.f32 %v2565_v39, %v3127_v60  ;;  %v1348_v41 = vrot.slane %v3241_v7, 1 }
 0x147   : > { %v1499_v62 = vadd.f32 %v1483_v58, %v1463_v6  ;;  %2274 = vmatprep.mubr.msk.f32.mxu1 %vm464_vm1, %v1711_v38  ;;  %v1464_v13 = vadd.f32 %v1448_v21, %v1412_v48  ;;  %v1640_v47 = vadd.f32 %v1624_v17, %v1604_v26  ;;  %v1660_v34 = vmul.f32 %v2592_v57, %v3178_v44 }
 0x148   : > { %v1696_v45 = vmul.f32 %v2827_v3, %v1386_v52  ;;  %v1353_v5 = vsel %vm1350_vm7, %v1346_v43, %v1347_v46  ;;  %v1569_v4 = vadd.f32 %v1553_v59, %v1533_v15  ;;  %v1286_v30 = vrot.slane %v3231_v11, 7 }
 0x149   : > { %v1676_v23 = vadd.f32 %v1660_v34, %v1640_v47  ;;  %v1519_v60 = vmul.f32 %v2588_v55, %v1326_v49  ;;  %v1352_v50 = vsel %vm1350_vm7, %v1347_v46, %v1348_v41  ;;  %v1498_v36 = vadd.f32 %v3191_v19, %v1462_v53  ;;  %v3464_v19 = vld [vmem:[#allocation9_spill] sm:$0xff] }
 0x14a   : > { %v1484_v33 = vmul.f32 %v2586_v54, %v1386_v52  ;;  %v1605_v31 = vadd.f32 %v1589_v37, %v1569_v4  ;;  %v1625_v35 = vmul.f32 %v2602_v61, %v1326_v49  ;;  %v1661_v42 = vmul.f32 %v2592_v57, %v3202_v18 }
 0x14b   : > { %v1712_v43 = vadd.f32 %v1696_v45, %v1676_v23  ;;  %v1591_v14 = vmul.f32 %v2590_v56, %v1353_v5  ;;  %v1534_v58 = vadd.f32 %v1518_v12, %v1498_v36  ;;  %v1554_v16 = vmul.f32 %v2565_v39, %v3178_v44 }
 0x14c   : > { %v1641_v51 = vadd.f32 %v1625_v35, %v1605_v31  ;;  %v1292_v8 = vsel %vm1289_vm13, %v1285_v32, %v1286_v30  ;;  %v1388_v53 = vmul.f32 %v3464_v19, %v1352_v50  ;;  %v1287_v54 = vrot.slane %v3241_v7, 7  ;;  %v2159_v50 = vld [vmem:[%s3379_s6] ss:$0 sm:$0xff] }
 0x14d   : > { %2275 = vmatmul.mubr.msk.f32.gmra.mrb[12].mxu1 %vm464_vm1, %v1712_v43  ;;  %v1570_v37 = vadd.f32 %v1554_v16, %v1534_v58  ;;  %v1590_v27 = vmul.f32 %v2590_v56, %v1386_v52  ;;  %v1535_v40 = vadd.f32 %v1519_v60, %v1499_v62  ;;  %v1555_v1 = vmul.f32 %v2565_v39, %v3202_v18 }
 0x14e   : > { %v1677_v48 = vadd.f32 %v1661_v42, %v1641_v51  ;;  %v1697_v44 = vmul.f32 %v2827_v3, %v1353_v5  ;;  %v1291_v21 = vsel %vm1289_vm13, %v1286_v30, %v1287_v54  ;;  %v1349_v32 = vrot.slane %v2845_v28, 1 }
 0x14f   : > { %v1606_v6 = vadd.f32 %v1590_v27, %v1570_v37  ;;  %v1626_v2 = vmul.f32 %v2602_v61, %v1292_v8  ;;  %v1328_v0 = vmul.f32 %v3465_v10, %v1291_v21  ;;  %v1571_v24 = vadd.f32 %v1555_v1, %v1535_v40 }
 0x150   : > { %v1713_v9 = vadd.f32 %v1697_v44, %v1677_v48  ;;  %v1520_v52 = vmul.f32 %v2588_v55, %v1292_v8  ;;  %v1662_v18 = vmul.f32 %v2592_v57, %v3231_v11  ;;  %v1500_v46 = vadd.f32 %v1484_v33, %v1464_v13 }
 0x151   : > { %v1642_v22 = vadd.f32 %v1626_v2, %v1606_v6  ;;  %v1698_v38 = vmul.f32 %v2827_v3, %v1388_v53  ;;  %v1607_v26 = vadd.f32 %v1591_v14, %v1571_v24  ;;  %v1627_v17 = vmul.f32 %v2602_v61, %v1328_v0 }
 0x152   : > { %2277 = vmatprep.mubr.msk.f32.mxu1 %vm464_vm1, %v1713_v9  ;;  %v1351_v63 = vsel %vm1350_vm7, %v1348_v41, %v1349_v32  ;;  %v1663_v49 = vmul.f32 %v2592_v57, %v3241_v7  ;;  %v1536_v12 = vadd.f32 %v1520_v52, %v1500_v46  ;;  %v1556_v55 = vmul.f32 %v2565_v39, %v3231_v11  ;;  %v3467_v11 = vld [vmem:[#allocation11_spill] sm:$0xff] }
 0x153   : > { %v1678_v15 = vadd.f32 %v1662_v18, %v1642_v22  ;;  %v1643_v59 = vadd.f32 %v1627_v17, %v1607_v26  ;;  %v3466_v62 = vrot.slane %v2845_v28, 7  ;;  %v1370_v47 = vsel %vm1350_vm7, %v1349_v32, %v1330_v29 }
 0x154   : > { %v1592_v41 = vmul.f32 %v2590_v56, %v1388_v53  ;;  %v1572_v34 = vadd.f32 %v1556_v55, %v1536_v12  ;;  %v1699_v39 = vmul.f32 %v2827_v3, %v1351_v63  ;;  %v1390_v5 = vmul.f32 %v3467_v11, %v1370_v47 }
 0x155   : > { %v1290_v13 = vsel %vm1289_vm13, %v1287_v54, %v3466_v62  ;;  %v1714_v7 = vadd.f32 %v1698_v38, %v1678_v15  ;;  %v1679_v45 = vadd.f32 %v1663_v49, %v1643_v59  ;;  %vm1921_vm7 = vcmask 64512  }
 0x156   : > { %v1608_v4 = vadd.f32 %v1592_v41, %v1572_v34  ;;  %v1628_v30 = vmul.f32 %v2602_v61, %v1290_v13  ;;  %v1700_v29 = vmul.f32 %v2827_v3, %v1390_v5 }
 0x157   : > { %2278 = vmatmul.mubr.msk.f32.gmra.mrb[14].mxu1 %vm464_vm1, %v1714_v7  ;;  %v1715_v23 = vadd.f32 %v1699_v39, %v1679_v45 }
 0x158   : > { %v1644_v20 = vadd.f32 %v1628_v30, %v1608_v4 }
 0x159   : > { %2280 = vmatprep.mubr.msk.f32.mxu1 %vm464_vm1, %v1715_v23 }
 0x15a   : > { %v1680_v56 = vadd.f32 %v1664_v25, %v1644_v20 }
 0x15c   : > { %v1716_v60 = vadd.f32 %v1700_v29, %v1680_v56 }
 0x15e   : > { %2281 = vmatmul.mubr.msk.f32.gmra.mrb[16].mxu1 %vm464_vm1, %v1716_v60 }
 0x204   : > { %v2261_v57 = vpop.f32.mrb[2].mxu1 }
 0x205   : > { %v1848_v61 = vadd.f32 %v2261_v57, %v2159_v50  ;;  %v1842_v3 = vpop.f32.mrb[3].mxu1 }
 0x206   : > { %v1843_v28 = vadd.f32 %v2159_v50, %v1842_v3 }
 0x207   : > { %1923 = vst.msk [vmem:[%s3324_s19 + $0x8] sm:$0xff] %vm1921_vm7, %v1848_v61 }
 0x208   : > { %1922 = vst.msk [vmem:[%s3324_s19] sm:$0xff] %vm1921_vm7, %v1843_v28  ;;  %v2264_v36 = vpop.f32.mrb[4].mxu1 }
 0x209   : > { %v1858_v33 = vadd.f32 %v2264_v36, %v2159_v50  ;;  %v1852_v31 = vpop.f32.mrb[5].mxu1 }
 0x20a   : > { %v1853_v35 = vadd.f32 %v2159_v50, %v1852_v31 }
 0x20b   : > { %1925 = vst.msk [vmem:[%s3324_s19 + $0x18] sm:$0xff] %vm1921_vm7, %v1858_v33 }
 0x20c   : > { %1924 = vst.msk [vmem:[%s3324_s19 + $0x10] sm:$0xff] %vm1921_vm7, %v1853_v35  ;;  %v2267_v42 = vpop.f32.mrb[6].mxu1 }
 0x20d   : > { %v1868_v43 = vadd.f32 %v2267_v42, %v2159_v50  ;;  %v1862_v14 = vpop.f32.mrb[7].mxu1 }
 0x20e   : > { %v1863_v58 = vadd.f32 %v2159_v50, %v1862_v14 }
 0x20f   : > { %1927 = vst.msk [vmem:[%s3324_s19 + $0x28] sm:$0xff] %vm1921_vm7, %v1868_v43 }
 0x210   : > { %1926 = vst.msk [vmem:[%s3324_s19 + $0x20] sm:$0xff] %vm1921_vm7, %v1863_v58  ;;  %v2270_v16 = vpop.f32.mrb[8].mxu1 }
 0x211   : > { %v1878_v51 = vadd.f32 %v2270_v16, %v2159_v50  ;;  %v1872_v8 = vpop.f32.mrb[9].mxu1 }
 0x212   : > { %v1873_v19 = vadd.f32 %v2159_v50, %v1872_v8 }
 0x213   : > { %1929 = vst.msk [vmem:[%s3324_s19 + $0x38] sm:$0xff] %vm1921_vm7, %v1878_v51 }
 0x214   : > { %1928 = vst.msk [vmem:[%s3324_s19 + $0x30] sm:$0xff] %vm1921_vm7, %v1873_v19 }
 0x215   : > { %v2273_v53 = vpop.f32.mrb[10].mxu1 }
 0x216   : > { %v1888_v54 = vadd.f32 %v2273_v53, %v2159_v50  ;;  %v1882_v37 = vpop.f32.mrb[11].mxu1 }
 0x217   : > { %v1883_v27 = vadd.f32 %v2159_v50, %v1882_v37 }
 0x218   : > { %1931 = vst.msk [vmem:[%s3324_s19 + $0x48] sm:$0xff] %vm1921_vm7, %v1888_v54 }
 0x219   : > { %1930 = vst.msk [vmem:[%s3324_s19 + $0x40] sm:$0xff] %vm1921_vm7, %v1883_v27 }
 0x220   : > { %v2276_v40 = vpop.f32.mrb[12].mxu1 }
 0x221   : > { %v1898_v1 = vadd.f32 %v2276_v40, %v2159_v50  ;;  %v1892_v48 = vpop.f32.mrb[13].mxu1 }
 0x222   : > { %v1893_v44 = vadd.f32 %v2159_v50, %v1892_v48 }
 0x223   : > { %1933 = vst.msk [vmem:[%s3324_s19 + $0x58] sm:$0xff] %vm1921_vm7, %v1898_v1 }
 0x224   : > { %1932 = vst.msk [vmem:[%s3324_s19 + $0x50] sm:$0xff] %vm1921_vm7, %v1893_v44 }
 0x22a   : > { %v2279_v21 = vpop.f32.mrb[14].mxu1 }
 0x22b   : > { %v1908_v32 = vadd.f32 %v2279_v21, %v2159_v50  ;;  %v1902_v6 = vpop.f32.mrb[15].mxu1 }
 0x22c   : > { %v1903_v2 = vadd.f32 %v2159_v50, %v1902_v6 }
 0x22d   : > { %1935 = vst.msk [vmem:[%s3324_s19 + $0x68] sm:$0xff] %vm1921_vm7, %v1908_v32 }
 0x22e   : > { %1934 = vst.msk [vmem:[%s3324_s19 + $0x60] sm:$0xff] %vm1921_vm7, %v1903_v2 }
 0x231   : > { %v2282_v10 = vpop.f32.mrb[16].mxu1 }
 0x232   : > { %v1918_v0 = vadd.f32 %v2282_v10, %v2159_v50  ;;  %v1912_v24 = vpop.f32.mrb[17].mxu1 }
 0x233   : > { %v1913_v9 = vadd.f32 %v2159_v50, %v1912_v24 }
 0x234   : > { %1937 = vst.msk [vmem:[%s3324_s19 + $0x78] sm:$0xff] %vm1921_vm7, %v1918_v0 }
 0x235   : > { %1936 = vst.msk [vmem:[%s3324_s19 + $0x70] sm:$0xff] %vm1921_vm7, %v1913_v9 }
 0x236 PF: > { %s17_s28 = sadd.s32 1, %s2374_s28   ;;  %s3468_s24 = smov %s2366_s26 }
 0x237   : > { %p14_p12 = scmp.ge.s32.totalorder %s17_s28, 6   ;;  %s3469_s25 = smov %s2370_s27 }
 0x238   : > { %s3470_s26 = smov %s3473_s29  ;;  %s3471_s27 = smov %s3477_s30 }
 0x239   :  { %16 = sbr.rel (!%p14_p12) target bundleno = 3 (0x3), region = 84 }

</bundles_post_ra>
